<compile_context>
chip_gen: v6e
topology: v6e:2x2x1
jax: 0.10.0
libtpu: 0.0.40
codegen_flags: <defaults>
</compile_context>

<pallas_src>
import math

import jax
import jax.numpy as jnp
from jax.experimental import pallas as pl
from jax.experimental.pallas import tpu as pltpu


def _tensor_network_kernel(e1_ref, e2_ref, w2_ref, wfin_ref, bias_ref, out_ref):
    """relu( bilinear(e1, W, e2) + concat(e1,e2) @ Wblock^T + bias ) for one batch tile."""
    e1 = e1_ref[...]                                    # (Bt, F3) f32
    e2 = e2_ref[...]                                    # (Bt, F3) f32
    f3 = e1_ref.shape[1]
    t = w2_ref.shape[1] // f3                           # static

    # m1[b, t*F3 + i] = sum_j e2[b, j] * W[i, j, t]      (MXU: K=F3, N=T*F3)
    m1 = jnp.dot(e2, w2_ref[...], preferred_element_type=jnp.float32)

    # prod[b, t*F3 + i] = e1[b, i] * m1[b, t*F3 + i]
    # (lane replication; jnp.tile is the documented replacement for pltpu.repeat)
    prod = jnp.tile(e1, (1, t)) * m1                    # (Bt, T*F3) VPU multiply

    # Fused final contraction (single MXU op):
    #   rows [0, T*F3)           of wfin = kron(I_T, 1_F3)   -> sum prod over i  (bilinear scoring)
    #   rows [T*F3, T*F3+F3)     of wfin = Wblock[:, :F3]^T  -> e1 part of block scoring
    #   rows [T*F3+F3, +2*F3)    of wfin = Wblock[:, F3:]^T  -> e2 part of block scoring
    combined = jnp.concatenate([prod, e1, e2], axis=1)  # (Bt, T*F3 + 2*F3)
    scores = jnp.dot(combined, wfin_ref[...],
                     preferred_element_type=jnp.float32)            # (Bt, T)

    out_ref[...] = jnp.maximum(scores + bias_ref[...], 0.0)


def _tensorcores_per_chip():
    """2 on v7x (dual TensorCore), 1 on v5e/v6e; safe fallback to 1."""
    try:
        kind = jax.devices()[0].device_kind.lower()
    except Exception:
        return 1
    return 2 if "7" in kind else 1


def tensor_network_forward(embedding_1, embedding_2, weight_matrix,
                           weight_matrix_block, bias, *, batch_tile=None,
                           max_batch_tile=512):
    """Pallas wrapper.

    embedding_1, embedding_2 : (B, F3)
    weight_matrix            : (F3, F3, T)
    weight_matrix_block      : (T, 2*F3)
    bias                     : (T, 1)
    returns scores           : (B, T)
    """
    B, F3 = embedding_1.shape
    T = weight_matrix.shape[-1]

    # ---- batch tiling: one grid step per TensorCore when it fits ------------
    if batch_tile is None:
        batch_tile = min(pl.cdiv(B, _tensorcores_per_chip()), max_batch_tile)
    batch_tile = max(8, int(batch_tile))
    batch_tile = (batch_tile + 7) // 8 * 8               # sublane-aligned tile
    B_pad = pl.cdiv(B, batch_tile) * batch_tile
    if B_pad != B:                                       # pad ragged batches
        pad = ((0, B_pad - B), (0, 0))
        embedding_1 = jnp.pad(embedding_1, pad)
        embedding_2 = jnp.pad(embedding_2, pad)
    nb = B_pad // batch_tile

    # ---- parameter-layout glue (plain JAX, once per call, constant-foldable) -
    # w2[j, t*F3 + i] = W[i, j, t]  -> m1 = e2 @ w2 contracts over j on the MXU.
    w2 = jnp.transpose(weight_matrix, (1, 2, 0)).reshape(F3, T * F3)
    # S_sum sums groups of F3 lanes: S_sum[t*F3 + i, t'] = (t == t').
    s_sum = jnp.kron(jnp.eye(T, dtype=jnp.float32),
                     jnp.ones((F3, 1), dtype=jnp.float32))           # (T*F3, T)
    wb1 = jnp.transpose(weight_matrix_block[:, :F3], (1, 0))         # (F3, T)
    wb2 = jnp.transpose(weight_matrix_block[:, F3:], (1, 0))         # (F3, T)
    w_final = jnp.concatenate([s_sum, wb1, wb2], axis=0)             # (T*F3+2F3, T)
    bias_row = bias.reshape(1, T)                                    # (1, T)

    K2 = T * F3 + 2 * F3
    cost = pl.CostEstimate(
        flops=2 * B_pad * (F3 * T * F3 + K2 * T),
        transcendentals=0,
        bytes_accessed=4 * (2 * B_pad * F3 + F3 * T * F3 + K2 * T + T + B_pad * T),
    )

    out = pl.pallas_call(
        _tensor_network_kernel,
        out_shape=jax.ShapeDtypeStruct((B_pad, T), jnp.float32),
        grid=(nb,),
        in_specs=[
            pl.BlockSpec((batch_tile, F3), lambda i: (i, 0)),   # e1 tile
            pl.BlockSpec((batch_tile, F3), lambda i: (i, 0)),   # e2 tile
            pl.BlockSpec((F3, T * F3), lambda i: (0, 0)),       # w2      (replicated)
            pl.BlockSpec((K2, T), lambda i: (0, 0)),            # w_final (replicated)
            pl.BlockSpec((1, T), lambda i: (0, 0)),             # bias    (replicated)
        ],
        out_specs=pl.BlockSpec((batch_tile, T), lambda i: (i, 0)),
        compiler_params=pltpu.CompilerParams(
            dimension_semantics=("parallel",)),                 # megacore on v7x
        cost_estimate=cost,
    )(embedding_1, embedding_2, w2, w_final, bias_row)

    return out[:B]


def _reference(e1, e2, W, Wb, bias):
    """Pure-JAX transcription of the PyTorch forward (for verification)."""
    B, F3 = e1.shape
    T = W.shape[-1]
    hp = jax.lax.Precision.HIGHEST
    scoring = jnp.matmul(e1, W.reshape(F3, F3 * T), precision=hp)   # (B, F3*T)
    scoring = scoring.reshape(B, F3, T).transpose(0, 2, 1)          # (B, T, F3)
    scoring = jnp.einsum("btf,bf->bt", scoring, e2, precision=hp)   # (B, T)
    combined = jnp.concatenate([e1, e2], axis=1)                    # (B, 2*F3)
    block = jnp.matmul(combined, Wb.T, precision=hp)                # (B, T)
    return jax.nn.relu(scoring + block + bias.reshape(-1))


def _xavier_uniform(key, shape):
    """Deterministic Xavier-uniform init matching torch.nn.init semantics."""
    if len(shape) == 2:
        fan_in, fan_out = shape[1], shape[0]
    else:  # (F3, F3, T): receptive field = prod of trailing dims
        rf = 1
        for d in shape[2:]:
            rf *= d
        fan_in, fan_out = shape[1] * rf, shape[0] * rf
    bound = math.sqrt(6.0 / (fan_in + fan_out))
    return jax.random.uniform(key, shape, jnp.float32, -bound, bound)


if __name__ == "__main__":
    # SimGNN-like config: filters_3 = 32, tensor_neurons = 16; a batch of graph
    # pairs so the batched grid (and the "parallel" axis on v7x) is exercised.
    B, F3, T = 256, 32, 16

    key = jax.random.PRNGKey(0)
    k_e1, k_e2, k_w, k_wb, k_b = jax.random.split(key, 5)

    embedding_1 = jax.random.normal(k_e1, (B, F3), jnp.float32)
    embedding_2 = jax.random.normal(k_e2, (B, F3), jnp.float32)

    weight_matrix = _xavier_uniform(k_w, (F3, F3, T))          # (F3, F3, T)
    weight_matrix_block = _xavier_uniform(k_wb, (T, 2 * F3))   # (T, 2*F3)
    bias = _xavier_uniform(k_b, (T, 1))                        # (T, 1)

    scores = tensor_network_forward(embedding_1, embedding_2, weight_matrix,
                                    weight_matrix_block, bias)
    scores = jax.block_until_ready(scores)

    expected = _reference(embedding_1, embedding_2, weight_matrix,
                          weight_matrix_block, bias)
    assert scores.shape == (B, T)
    assert jnp.allclose(scores, expected, atol=1e-4, rtol=1e-4), (
        "Pallas kernel output mismatch vs JAX reference")

    print("KERNEL_OK")
</pallas_src>

<mosaic_0001>
module attributes {stable_mosaic.version = 11 : i64} {
  func.func @_tensor_network_kernel(%arg0: i32, %arg1: memref<256x32xf32, #tpu.memory_space<vmem>>, %arg2: memref<256x32xf32, #tpu.memory_space<vmem>>, %arg3: memref<32x512xf32, #tpu.memory_space<vmem>>, %arg4: memref<576x16xf32, #tpu.memory_space<vmem>>, %arg5: memref<1x16xf32, #tpu.memory_space<vmem>>, %arg6: memref<256x16xf32, #tpu.memory_space<vmem>>) attributes {dimension_semantics = [#tpu.dimension_semantics<parallel>], iteration_bounds = array<i64: 1>, scalar_prefetch = 0 : i64, scratch_operands = 0 : i64, tpu.core_type = #tpu.core_type<tc>, window_params = [{transform_indices = @transform_0, window_bounds = array<i64: 256, 32>}, {transform_indices = @transform_1, window_bounds = array<i64: 256, 32>}, {pipeline_mode = #tpu.pipeline_mode<synchronous>, transform_indices = @transform_2, window_bounds = array<i64: 32, 512>}, {pipeline_mode = #tpu.pipeline_mode<synchronous>, transform_indices = @transform_3, window_bounds = array<i64: 576, 16>}, {pipeline_mode = #tpu.pipeline_mode<synchronous>, transform_indices = @transform_4, window_bounds = array<i64: 1, 16>}, {transform_indices = @transform_5, window_bounds = array<i64: 256, 16>}]} {
    %c0 = arith.constant 0 : index
    %c0_0 = arith.constant 0 : index
    %0 = vector.load %arg1[%c0, %c0_0] : memref<256x32xf32, #tpu.memory_space<vmem>>, vector<256x32xf32>
    %c0_1 = arith.constant 0 : index
    %c0_2 = arith.constant 0 : index
    %1 = vector.load %arg2[%c0_1, %c0_2] : memref<256x32xf32, #tpu.memory_space<vmem>>, vector<256x32xf32>
    %c0_3 = arith.constant 0 : index
    %c0_4 = arith.constant 0 : index
    %2 = vector.load %arg3[%c0_3, %c0_4] : memref<32x512xf32, #tpu.memory_space<vmem>>, vector<32x512xf32>
    %cst = arith.constant dense<0.000000e+00> : vector<256x512xf32>
    %3 = tpu.matmul %1, %2, %cst {dimension_numbers = #tpu.dot_dimension_numbers<[1], [0], [0], [1], [0, 0, 1, 1], [], []>} : vector<256x32xf32>, vector<32x512xf32>, vector<256x512xf32> -> vector<256x512xf32>
    %4 = tpu.concatenate %0, %0, %0, %0, %0, %0, %0, %0, %0, %0, %0, %0, %0, %0, %0, %0 in 1 : vector<256x32xf32>, vector<256x32xf32>, vector<256x32xf32>, vector<256x32xf32>, vector<256x32xf32>, vector<256x32xf32>, vector<256x32xf32>, vector<256x32xf32>, vector<256x32xf32>, vector<256x32xf32>, vector<256x32xf32>, vector<256x32xf32>, vector<256x32xf32>, vector<256x32xf32>, vector<256x32xf32>, vector<256x32xf32> -> vector<256x512xf32>
    %5 = arith.mulf %4, %3 : vector<256x512xf32>
    %6 = tpu.concatenate %5, %0, %1 in 1 : vector<256x512xf32>, vector<256x32xf32>, vector<256x32xf32> -> vector<256x576xf32>
    %c0_5 = arith.constant 0 : index
    %c0_6 = arith.constant 0 : index
    %7 = vector.load %arg4[%c0_5, %c0_6] : memref<576x16xf32, #tpu.memory_space<vmem>>, vector<576x16xf32>
    %cst_7 = arith.constant dense<0.000000e+00> : vector<256x16xf32>
    %8 = tpu.matmul %6, %7, %cst_7 {dimension_numbers = #tpu.dot_dimension_numbers<[1], [0], [0], [1], [0, 0, 1, 1], [], []>} : vector<256x576xf32>, vector<576x16xf32>, vector<256x16xf32> -> vector<256x16xf32>
    %c0_8 = arith.constant 0 : index
    %c0_9 = arith.constant 0 : index
    %9 = vector.load %arg5[%c0_8, %c0_9] : memref<1x16xf32, #tpu.memory_space<vmem>>, vector<1x16xf32>
    %10 = vector.broadcast %9 : vector<1x16xf32> to vector<256x16xf32>
    %11 = arith.addf %8, %10 : vector<256x16xf32>
    %cst_10 = arith.constant 0.000000e+00 : f32
    %12 = vector.broadcast %cst_10 : f32 to vector<256x16xf32>
    %13 = arith.maximumf %11, %12 : vector<256x16xf32>
    %c0_11 = arith.constant 0 : index
    %c0_12 = arith.constant 0 : index
    %14 = vector.load %arg6[%c0_11, %c0_12] : memref<256x16xf32, #tpu.memory_space<vmem>>, vector<256x16xf32>
    tpu.vector_store %arg6[%c0_11, %c0_12], %13 {strides = array<i32>} : memref<256x16xf32, #tpu.memory_space<vmem>>, vector<256x16xf32>,
    return
  }
  func.func @transform_0(%arg0: i32) -> (i32, i32) {
    %c0_i32 = arith.constant 0 : i32
    %c0_i32_0 = arith.constant 0 : i32
    return %arg0, %c0_i32 : i32, i32
  }
  func.func @transform_1(%arg0: i32) -> (i32, i32) {
    %c0_i32 = arith.constant 0 : i32
    %c0_i32_0 = arith.constant 0 : i32
    return %arg0, %c0_i32 : i32, i32
  }
  func.func @transform_2(%arg0: i32) -> (i32, i32) {
    %c0_i32 = arith.constant 0 : i32
    %c0_i32_0 = arith.constant 0 : i32
    %c0_i32_1 = arith.constant 0 : i32
    return %c0_i32, %c0_i32_0 : i32, i32
  }
  func.func @transform_3(%arg0: i32) -> (i32, i32) {
    %c0_i32 = arith.constant 0 : i32
    %c0_i32_0 = arith.constant 0 : i32
    %c0_i32_1 = arith.constant 0 : i32
    return %c0_i32, %c0_i32_0 : i32, i32
  }
  func.func @transform_4(%arg0: i32) -> (i32, i32) {
    %c0_i32 = arith.constant 0 : i32
    %c0_i32_0 = arith.constant 0 : i32
    %c0_i32_1 = arith.constant 0 : i32
    return %c0_i32, %c0_i32_0 : i32, i32
  }
  func.func @transform_5(%arg0: i32) -> (i32, i32) {
    %c0_i32 = arith.constant 0 : i32
    %c0_i32_0 = arith.constant 0 : i32
    return %arg0, %c0_i32 : i32, i32
  }
}

</mosaic_0001>

<bundles_post_ra>
// kernel: tpu_custom_call.1
= control target key start
LH: loop header
LB: loop body
LE: loop exit
PB: predicated region body
PF: predicated region fallthrough
CT: control target
= control target key end

     0   :  { %v4809_v3 = vmov 0.0   ;;  %s2565_s26 = smov 32   ;;  %s2566_s29 = smov 96   ;;  %vm100_vm0 = vcmask 261120   ;;  %vm1063_vm1 = vcmask 523264   ;;  %vm1096_vm2 = vcmask 785408   ;;  %s4803_s2 = inlined_call_operand.vmem [shape: f32[32,512], index: 2, kind: input, shape index: {}]   ;;  %s4804_s0 = inlined_call_operand.vmem [shape: f32[256,32], index: 0, kind: input, shape index: {}]   ;;  %s4805_s1 = inlined_call_operand.vmem [shape: f32[256,32], index: 1, kind: input, shape index: {}]   ;;  %s4806_s3 = inlined_call_operand.vmem [shape: f32[576,16], index: 3, kind: input, shape index: {}]   ;;  %s4807_s4 = inlined_call_operand.vmem [shape: f32[1,16], index: 4, kind: input, shape index: {}]   ;;  %s4808_s5 = inlined_call_operand.vmem [shape: f32[256,16], index: 5, kind: output, shape index: {}]  }
   0x1   :  { %v97_v0 = vld [vmem:[%s4803_s2 + $0x68] sm:$0xff]  ;;  %v2604_v1 = vld [vmem:[%s4804_s0] sm:$0xff]  ;;  %261 = vmatprep.mubr.f32.mxu0 %v4809_v3  ;;  %405 = vmatprep.mubr.f32.mxu1 %v4809_v3  ;;  %s2567_s13 = smov 64   ;;  %v99_v13 = vld [vmem:[%s4803_s2 + $0x78] sm:$0xff]  ;;  %vm2267_vm3 = vcmask 130048  }
   0x2   :  { %v96_v2 = vld [vmem:[%s4803_s2 + $0x60] sm:$0xff]  ;;  %221 = vmatprep.subr.mxu0 %v97_v0  ;;  %2505 = vmatprep.subr.mxu1 %v97_v0  ;;  %v93_v4 = vld [vmem:[%s4803_s2 + $0x48] sm:$0xff]  ;;  %v22_v16 = vld [vmem:[%s4804_s0 + $0x10] sm:$0xff] }
   0x3   :  { %743 = vrot.lane.b32.xlu0 %v2604_v1, %s2565_s26  ;;  %222 = vmatpush1.msra.mxu0 %v96_v2  ;;  %v92_v5 = vld [vmem:[%s4803_s2 + $0x40] sm:$0xff]  ;;  %v89_v6 = vld [vmem:[%s4803_s2 + $0x28] sm:$0xff]  ;;  %v98_v17 = vld [vmem:[%s4803_s2 + $0x70] sm:$0xff] }
   0x4   :  { %2509 = vmatpush1.msra.mxu1 %v96_v2  ;;  %935 = vrot.lane.b32.xlu1 %v2604_v1, %s2566_s29  ;;  %v88_v7 = vld [vmem:[%s4803_s2 + $0x20] sm:$0xff]  ;;  %v21_v8 = vld [vmem:[%s4804_s0 + $0x8] sm:$0xff]  ;;  %v2686_v18 = vld [vmem:[%s4805_s1 + $0x10] sm:$0xff] }
   0x5   :  { %223 = vmatprep.subr.mxu0 %v93_v4  ;;  %2506 = vmatprep.subr.mxu1 %v93_v4  ;;  %v85_v9 = vld [vmem:[%s4803_s2 + $0x8] sm:$0xff]  ;;  %v84_v10 = vld [vmem:[%s4803_s2] sm:$0xff]  ;;  %v2691_v19 = vld [vmem:[%s4805_s1 + $0xd0] sm:$0xff] }
   0x6   :  { %224 = vmatpush1.msra.mxu0 %v92_v5  ;;  %2510 = vmatpush1.msra.mxu1 %v92_v5  ;;  %v2642_v11 = vld [vmem:[%s4805_s1] sm:$0xff]  ;;  %v2661_v14 = vld [vmem:[%s4805_s1 + $0x8] sm:$0xff]  ;;  %v23_v20 = vld [vmem:[%s4804_s0 + $0x18] sm:$0xff] }
   0x7   :  { %225 = vmatprep.subr.mxu0 %v89_v6  ;;  %2507 = vmatprep.subr.mxu1 %v89_v6  ;;  %v2647_v12 = vld [vmem:[%s4805_s1 + $0xc0] sm:$0xff]  ;;  %v2666_v15 = vld [vmem:[%s4805_s1 + $0xc8] sm:$0xff]  ;;  %v95_v21 = vld [vmem:[%s4803_s2 + $0x58] sm:$0xff] }
   0x8   :  { %839 = vrot.lane.b32.xlu0 %v2604_v1, %s2567_s13  ;;  %226 = vmatpush1.msra.mxu0 %v88_v7  ;;  %v2710_v22 = vld [vmem:[%s4805_s1 + $0x18] sm:$0xff]  ;;  %v94_v24 = vld [vmem:[%s4803_s2 + $0x50] sm:$0xff]  ;;  %v2734_v26 = vld [vmem:[%s4805_s1 + $0x20] sm:$0xff] }
   0x9   :  { %2511 = vmatpush1.msra.mxu1 %v88_v7  ;;  %745 = vrot.lane.b32.xlu1 %v21_v8, %s2565_s26  ;;  %v2715_v23 = vld [vmem:[%s4805_s1 + $0xd8] sm:$0xff]  ;;  %v2739_v27 = vld [vmem:[%s4805_s1 + $0xe0] sm:$0xff]  ;;  %v2758_v30 = vld [vmem:[%s4805_s1 + $0x28] sm:$0xff] }
   0xa   :  { %227 = vmatprep.subr.mxu0 %v85_v9  ;;  %2508 = vmatprep.subr.mxu1 %v85_v9  ;;  %v1400_v25 = vld [vmem:[%s4806_s3 + $0x78] sm:$0xff]  ;;  %v24_v28 = vld [vmem:[%s4804_s0 + $0x20] sm:$0xff]  ;;  %v2763_v31 = vld [vmem:[%s4805_s1 + $0xe8] sm:$0xff] }
   0xb   :  { %228 = vmatpush1.msra.mxu0 %v84_v10  ;;  %2512 = vmatpush1.msra.mxu1 %v84_v10  ;;  %v91_v29 = vld [vmem:[%s4803_s2 + $0x38] sm:$0xff]  ;;  %v25_v32 = vld [vmem:[%s4804_s0 + $0x28] sm:$0xff]  ;;  %v90_v33 = vld [vmem:[%s4803_s2 + $0x30] sm:$0xff] }
   0xc   :  { %2304 = vmatmul.mubr.msk.f32.vlgmr.msra.gmra.mxu0 %vm100_vm0, %v2642_v11  ;;  %2328 = vmatmul.mubr.msk.f32.vlgmr.msra.gmra.mxu1 %vm100_vm0, %v2647_v12  ;;  %v1399_v34 = vld [vmem:[%s4806_s3 + $0x70] sm:$0xff]  ;;  %v87_v37 = vld [vmem:[%s4803_s2 + $0x18] sm:$0xff]  ;;  %v1398_v42 = vld [vmem:[%s4806_s3 + $0x68] sm:$0xff] }
   0xd   :  { %841 = vrot.lane.b32.xlu0 %v21_v8, %s2567_s13  ;;  %937 = vrot.lane.b32.xlu1 %v21_v8, %s2566_s29  ;;  %v2786_v35 = vld [vmem:[%s4805_s1 + $0x30] sm:$0xff]  ;;  %v2807_v38 = vld [vmem:[%s4805_s1 + $0x38] sm:$0xff] }
   0xe   :  { %267 = vmatprep.mubr.f32.mxu0 %v4809_v3  ;;  %411 = vmatprep.mubr.f32.mxu1 %v4809_v3  ;;  %v2791_v36 = vld [vmem:[%s4805_s1 + $0xf0] sm:$0xff]  ;;  %v2812_v39 = vld [vmem:[%s4805_s1 + $0xf8] sm:$0xff]  ;;  %v2835_v43 = vld [vmem:[%s4805_s1 + $0x40] sm:$0xff] }
   0xf   :  { %478 = vmatprep.subr.mxu1 %v99_v13  ;;  %1560 = vmatprep.subr.mxu0 %v4809_v3  ;;  %v26_v40 = vld [vmem:[%s4804_s0 + $0x30] sm:$0xff]  ;;  %v27_v44 = vld [vmem:[%s4804_s0 + $0x38] sm:$0xff]  ;;  %v2851_v45 = vld [vmem:[%s4805_s1 + $0x48] sm:$0xff] }
  0x10   :  { %2305 = vmatmul.mubr.msk.f32.gmra.mxu0 %vm100_vm0, %v2661_v14  ;;  %2329 = vmatmul.mubr.msk.f32.gmra.mxu1 %vm100_vm0, %v2666_v15  ;;  %v86_v41 = vld [vmem:[%s4803_s2 + $0x10] sm:$0xff]  ;;  %v1397_v46 = vld [vmem:[%s4806_s3 + $0x60] sm:$0xff]  ;;  %v1432_v47 = vld [vmem:[%s4806_s3 + $0x178] sm:$0xff] }
  0x11   :  { %747 = vrot.lane.b32.xlu0 %v22_v16, %s2565_s26  ;;  %843 = vrot.lane.b32.xlu1 %v22_v16, %s2567_s13  ;;  %v2872_v48 = vld [vmem:[%s4805_s1 + $0x50] sm:$0xff]  ;;  %v28_v49 = vld [vmem:[%s4804_s0 + $0x40] sm:$0xff] }
  0x12   :  { %273 = vmatprep.mubr.f32.mxu0 %v4809_v3  ;;  %417 = vmatprep.mubr.f32.mxu1 %v4809_v3  ;;  %v2888_v50 = vld [vmem:[%s4805_s1 + $0x58] sm:$0xff]  ;;  %v29_v51 = vld [vmem:[%s4804_s0 + $0x48] sm:$0xff]  ;;  %v1431_v53 = vld [vmem:[%s4806_s3 + $0x170] sm:$0xff] }
  0x13   :  { %479 = vmatpush1.msra.mxu1 %v98_v17  ;;  %1561 = vmatpush1.msra.mxu0 %v1400_v25  ;;  %v1396_v52 = vld [vmem:[%s4806_s3 + $0x58] sm:$0xff]  ;;  %v2912_v54 = vld [vmem:[%s4805_s1 + $0x60] sm:$0xff]  ;;  %v2925_v55 = vld [vmem:[%s4805_s1 + $0x68] sm:$0xff] }
  0x14   :  { %2306 = vmatmul.mubr.msk.f32.gmra.mxu0 %vm100_vm0, %v2686_v18  ;;  %2330 = vmatmul.mubr.msk.f32.gmra.mxu1 %vm100_vm0, %v2691_v19  ;;  %v30_v56 = vld [vmem:[%s4804_s0 + $0x50] sm:$0xff]  ;;  %v1430_v58 = vld [vmem:[%s4806_s3 + $0x168] sm:$0xff]  ;;  %v31_v60 = vld [vmem:[%s4804_s0 + $0x58] sm:$0xff] }
  0x15   :  { %939 = vrot.lane.b32.xlu0 %v22_v16, %s2566_s29  ;;  %749 = vrot.lane.b32.xlu1 %v23_v20, %s2565_s26  ;;  %v1395_v57 = vld [vmem:[%s4806_s3 + $0x50] sm:$0xff]  ;;  %v2965_v61 = vld [vmem:[%s4805_s1 + $0x78] sm:$0xff] }
  0x16   :  { %279 = vmatprep.mubr.f32.mxu0 %v4809_v3  ;;  %423 = vmatprep.mubr.f32.mxu1 %v4809_v3  ;;  %v2949_v59 = vld [vmem:[%s4805_s1 + $0x70] sm:$0xff]  ;;  %v1394_v62 = vld [vmem:[%s4806_s3 + $0x48] sm:$0xff]  ;;  %v1429_v63 = vld [vmem:[%s4806_s3 + $0x160] sm:$0xff] }
  0x17   :  { %480 = vmatprep.subr.mxu1 %v95_v21  ;;  %1562 = vmatprep.subr.mxu0 %v4809_v3  ;;  %v2986_v0 = vld [vmem:[%s4805_s1 + $0x80] sm:$0xff]  ;;  %v3002_v4 = vld [vmem:[%s4805_s1 + $0x88] sm:$0xff]  ;;  %v1428_v7 = vld [vmem:[%s4806_s3 + $0x158] sm:$0xff] }
  0x18   :  { %2307 = vmatmul.mubr.msk.f32.gmra.mxu0 %vm100_vm0, %v2710_v22  ;;  %2331 = vmatmul.mubr.msk.f32.gmra.mxu1 %vm100_vm0, %v2715_v23  ;;  %v32_v2 = vld [vmem:[%s4804_s0 + $0x60] sm:$0xff]  ;;  %v33_v5 = vld [vmem:[%s4804_s0 + $0x68] sm:$0xff]  ;;  %v3026_v8 = vld [vmem:[%s4805_s1 + $0x90] sm:$0xff] }
  0x19   :  { %845 = vrot.lane.b32.xlu0 %v23_v20, %s2567_s13  ;;  %941 = vrot.lane.b32.xlu1 %v23_v20, %s2566_s29  ;;  %v1393_v6 = vld [vmem:[%s4806_s3 + $0x40] sm:$0xff]  ;;  %v3039_v9 = vld [vmem:[%s4805_s1 + $0x98] sm:$0xff] }
  0x1a   :  { %285 = vmatprep.mubr.f32.mxu0 %v4809_v3  ;;  %429 = vmatprep.mubr.f32.mxu1 %v4809_v3  ;;  %v34_v10 = vld [vmem:[%s4804_s0 + $0x70] sm:$0xff]  ;;  %v35_v16 = vld [vmem:[%s4804_s0 + $0x78] sm:$0xff]  ;;  %v3079_v17 = vld [vmem:[%s4805_s1 + $0xa8] sm:$0xff] }
  0x1b   :  { %481 = vmatpush1.msra.mxu1 %v94_v24  ;;  %1563 = vmatpush1.msra.mxu0 %v1399_v34  ;;  %v1427_v13 = vld [vmem:[%s4806_s3 + $0x150] sm:$0xff]  ;;  %v1426_v20 = vld [vmem:[%s4806_s3 + $0x148] sm:$0xff]  ;;  %v36_v24 = vld [vmem:[%s4804_s0 + $0x80] sm:$0xff] }
  0x1c   :  { %2308 = vmatmul.mubr.msk.f32.gmra.mxu0 %vm100_vm0, %v2734_v26  ;;  %2332 = vmatmul.mubr.msk.f32.gmra.mxu1 %vm100_vm0, %v2739_v27  ;;  %v3100_v21 = vld [vmem:[%s4805_s1 + $0xb0] sm:$0xff]  ;;  %v3116_v25 = vld [vmem:[%s4805_s1 + $0xb8] sm:$0xff] }
  0x1d   :  { %751 = vrot.lane.b32.xlu0 %v24_v28, %s2565_s26  ;;  %847 = vrot.lane.b32.xlu1 %v24_v28, %s2567_s13  ;;  %v1388_v34 = vld [vmem:[%s4806_s3 + $0x18] sm:$0xff] }
  0x1e   :  { %291 = vmatprep.mubr.f32.mxu0 %v4809_v3  ;;  %435 = vmatprep.mubr.f32.mxu1 %v4809_v3 }
  0x1f   :  { %482 = vmatprep.subr.mxu1 %v91_v29  ;;  %1564 = vmatprep.subr.mxu0 %v4809_v3  ;;  %v1390_v29 = vld [vmem:[%s4806_s3 + $0x28] sm:$0xff] }
  0x20   :  { %2309 = vmatmul.mubr.msk.f32.gmra.mxu0 %vm100_vm0, %v2758_v30  ;;  %2333 = vmatmul.mubr.msk.f32.gmra.mxu1 %vm100_vm0, %v2763_v31 }
  0x21   :  { %943 = vrot.lane.b32.xlu0 %v24_v28, %s2566_s29  ;;  %753 = vrot.lane.b32.xlu1 %v25_v32, %s2565_s26  ;;  %v37_v28 = vld [vmem:[%s4804_s0 + $0x88] sm:$0xff] }
  0x22   :  { %297 = vmatprep.mubr.f32.mxu0 %v4809_v3  ;;  %441 = vmatprep.mubr.f32.mxu1 %v4809_v3 }
  0x23   :  { %483 = vmatpush1.msra.mxu1 %v90_v33  ;;  %1565 = vmatpush1.msra.mxu0 %v1398_v42  ;;  %v1389_v33 = vld [vmem:[%s4806_s3 + $0x20] sm:$0xff]  ;;  %v1386_v42 = vld [vmem:[%s4806_s3 + $0x8] sm:$0xff] }
  0x24   :  { %2310 = vmatmul.mubr.msk.f32.gmra.mxu0 %vm100_vm0, %v2786_v35  ;;  %2334 = vmatmul.mubr.msk.f32.gmra.mxu1 %vm100_vm0, %v2791_v36 }
  0x25   :  { %849 = vrot.lane.b32.xlu0 %v25_v32, %s2567_s13  ;;  %945 = vrot.lane.b32.xlu1 %v25_v32, %s2566_s29  ;;  %v1425_v32 = vld [vmem:[%s4806_s3 + $0x140] sm:$0xff] }
  0x26   :  { %303 = vmatprep.mubr.f32.mxu0 %v4809_v3  ;;  %447 = vmatprep.mubr.f32.mxu1 %v4809_v3 }
  0x27   :  { %484 = vmatprep.subr.mxu1 %v87_v37  ;;  %1566 = vmatprep.subr.mxu0 %v4809_v3  ;;  %v38_v37 = vld [vmem:[%s4804_s0 + $0x90] sm:$0xff] }
  0x28   :  { %2311 = vmatmul.mubr.msk.f32.gmra.mxu0 %vm100_vm0, %v2807_v38  ;;  %2335 = vmatmul.mubr.msk.f32.gmra.mxu1 %vm100_vm0, %v2812_v39 }
  0x29   :  { %755 = vrot.lane.b32.xlu0 %v26_v40, %s2565_s26  ;;  %851 = vrot.lane.b32.xlu1 %v26_v40, %s2567_s13 }
  0x2a   :  { %309 = vmatprep.mubr.f32.mxu0 %v4809_v3  ;;  %485 = vmatpush1.msra.mxu1 %v86_v41  ;;  %v1424_v41 = vld [vmem:[%s4806_s3 + $0x138] sm:$0xff] }
  0x2b   :  { %518 = vmatprep.mubr.f32.mxu1 %v4809_v3  ;;  %1785 = vmatprep.subr.mxu1 %v4809_v3 }
  0x2c   :  { %2312 = vmatmul.mubr.msk.f32.gmra.mxu0 %vm100_vm0, %v2835_v43  ;;  %2336 = vmatmul.mubr.msk.f32.vlgmr.msra.gmra.mxu1 %vm100_vm0, %v2642_v11  ;;  %v1392_v11 = vld [vmem:[%s4806_s3 + $0x38] sm:$0xff] }
  0x2d   :  { %947 = vrot.lane.b32.xlu0 %v26_v40, %s2566_s29  ;;  %757 = vrot.lane.b32.xlu1 %v27_v44, %s2565_s26  ;;  %v1387_v40 = vld [vmem:[%s4806_s3 + $0x10] sm:$0xff] }
  0x2e   :  { %315 = vmatprep.mubr.f32.mxu0 %v4809_v3  ;;  %524 = vmatprep.mubr.f32.mxu1 %v4809_v3 }
  0x2f   :  { %1567 = vmatpush1.msra.mxu0 %v1397_v46  ;;  %1786 = vmatpush1.msra.mxu1 %v1432_v47  ;;  %v1385_v46 = vld [vmem:[%s4806_s3] sm:$0xff] }
  0x30   :  { %2313 = vmatmul.mubr.msk.f32.gmra.mxu0 %vm100_vm0, %v2851_v45  ;;  %2337 = vmatmul.mubr.msk.f32.gmra.mxu1 %vm100_vm0, %v2661_v14  ;;  %v3063_v14 = vld [vmem:[%s4805_s1 + $0xa0] sm:$0xff] }
  0x31   :  { %853 = vrot.lane.b32.xlu0 %v27_v44, %s2567_s13  ;;  %949 = vrot.lane.b32.xlu1 %v27_v44, %s2566_s29  ;;  %v39_v44 = vld [vmem:[%s4804_s0 + $0x98] sm:$0xff] }
  0x32   :  { %321 = vmatprep.mubr.f32.mxu0 %v4809_v3  ;;  %530 = vmatprep.mubr.f32.mxu1 %v4809_v3 }
  0x33   :  { %1568 = vmatprep.subr.mxu0 %v4809_v3  ;;  %1787 = vmatprep.subr.mxu1 %v4809_v3 }
  0x34   :  { %2314 = vmatmul.mubr.msk.f32.gmra.mxu0 %vm100_vm0, %v2872_v48  ;;  %2338 = vmatmul.mubr.msk.f32.gmra.mxu1 %vm100_vm0, %v2686_v18  ;;  %v1391_v18 = vld [vmem:[%s4806_s3 + $0x30] sm:$0xff] }
  0x35   :  { %759 = vrot.lane.b32.xlu0 %v28_v49, %s2565_s26  ;;  %855 = vrot.lane.b32.xlu1 %v28_v49, %s2567_s13 }
  0x36   :  { %327 = vmatprep.mubr.f32.mxu0 %v4809_v3  ;;  %536 = vmatprep.mubr.f32.mxu1 %v4809_v3 }
  0x37   :  { %1569 = vmatpush1.msra.mxu0 %v1396_v52  ;;  %1788 = vmatpush1.msra.mxu1 %v1431_v53  ;;  %v1423_v53 = vld [vmem:[%s4806_s3 + $0x130] sm:$0xff] }
  0x38   :  { %2315 = vmatmul.mubr.msk.f32.gmra.mxu0 %vm100_vm0, %v2888_v50  ;;  %2339 = vmatmul.mubr.msk.f32.gmra.mxu1 %vm100_vm0, %v2710_v22 }
  0x39   :  { %951 = vrot.lane.b32.xlu0 %v28_v49, %s2566_s29  ;;  %761 = vrot.lane.b32.xlu1 %v29_v51, %s2565_s26 }
  0x3a   :  { %333 = vmatprep.mubr.f32.mxu0 %v4809_v3  ;;  %542 = vmatprep.mubr.f32.mxu1 %v4809_v3 }
  0x3b   :  { %1570 = vmatprep.subr.mxu0 %v4809_v3  ;;  %1789 = vmatprep.subr.mxu1 %v4809_v3 }
  0x3c   :  { %2316 = vmatmul.mubr.msk.f32.gmra.mxu0 %vm100_vm0, %v2912_v54  ;;  %2340 = vmatmul.mubr.msk.f32.gmra.mxu1 %vm100_vm0, %v2734_v26 }
  0x3d   :  { %857 = vrot.lane.b32.xlu0 %v29_v51, %s2567_s13  ;;  %953 = vrot.lane.b32.xlu1 %v29_v51, %s2566_s29  ;;  %v1416_v51 = vld [vmem:[%s4806_s3 + $0xf8] sm:$0xff] }
  0x3e   :  { %339 = vmatprep.mubr.f32.mxu0 %v4809_v3  ;;  %548 = vmatprep.mubr.f32.mxu1 %v4809_v3 }
  0x3f   :  { %1571 = vmatpush1.msra.mxu0 %v1395_v57  ;;  %1790 = vmatpush1.msra.mxu1 %v1430_v58  ;;  %v40_v57 = vld [vmem:[%s4804_s0 + $0xa0] sm:$0xff] }
  0x40   :  { %2317 = vmatmul.mubr.msk.f32.gmra.mxu0 %vm100_vm0, %v2925_v55  ;;  %2341 = vmatmul.mubr.msk.f32.gmra.mxu1 %vm100_vm0, %v2758_v30 }
  0x41   :  { %763 = vrot.lane.b32.xlu0 %v30_v56, %s2565_s26  ;;  %859 = vrot.lane.b32.xlu1 %v30_v56, %s2567_s13 }
  0x42   :  { %345 = vmatprep.mubr.f32.mxu0 %v4809_v3  ;;  %554 = vmatprep.mubr.f32.mxu1 %v4809_v3 }
  0x43   :  { %1572 = vmatprep.subr.mxu0 %v4809_v3  ;;  %1791 = vmatprep.subr.mxu1 %v4809_v3 }
  0x44   :  { %2318 = vmatmul.mubr.msk.f32.gmra.mxu0 %vm100_vm0, %v2949_v59  ;;  %2342 = vmatmul.mubr.msk.f32.gmra.mxu1 %vm100_vm0, %v2786_v35 }
  0x45   :  { %955 = vrot.lane.b32.xlu0 %v30_v56, %s2566_s29  ;;  %765 = vrot.lane.b32.xlu1 %v31_v60, %s2565_s26  ;;  %v1415_v56 = vld [vmem:[%s4806_s3 + $0xf0] sm:$0xff] }
  0x46   :  { %351 = vmatprep.mubr.f32.mxu0 %v4809_v3  ;;  %560 = vmatprep.mubr.f32.mxu1 %v4809_v3 }
  0x47   :  { %1573 = vmatpush1.msra.mxu0 %v1394_v62  ;;  %1792 = vmatpush1.msra.mxu1 %v1429_v63  ;;  %v1414_v63 = vld [vmem:[%s4806_s3 + $0xe8] sm:$0xff] }
  0x48   :  { %2319 = vmatmul.mubr.msk.f32.gmra.mxu0 %vm100_vm0, %v2965_v61  ;;  %2343 = vmatmul.mubr.msk.f32.gmra.mxu1 %vm100_vm0, %v2807_v38 }
  0x49   :  { %861 = vrot.lane.b32.xlu0 %v31_v60, %s2567_s13  ;;  %957 = vrot.lane.b32.xlu1 %v31_v60, %s2566_s29 }
  0x4a   :  { %357 = vmatprep.mubr.f32.mxu0 %v4809_v3  ;;  %566 = vmatprep.mubr.f32.mxu1 %v4809_v3 }
  0x4b   :  { %1574 = vmatprep.subr.mxu0 %v4809_v3  ;;  %1793 = vmatprep.subr.mxu1 %v4809_v3 }
  0x4c   :  { %2320 = vmatmul.mubr.msk.f32.gmra.mxu0 %vm100_vm0, %v2986_v0  ;;  %2344 = vmatmul.mubr.msk.f32.gmra.mxu1 %vm100_vm0, %v2835_v43 }
  0x4d   :  { %767 = vrot.lane.b32.xlu0 %v32_v2, %s2565_s26  ;;  %863 = vrot.lane.b32.xlu1 %v32_v2, %s2567_s13 }
  0x4e   :  { %363 = vmatprep.mubr.f32.mxu0 %v4809_v3  ;;  %572 = vmatprep.mubr.f32.mxu1 %v4809_v3 }
  0x4f   :  { %1575 = vmatpush1.msra.mxu0 %v1393_v6  ;;  %1794 = vmatpush1.msra.mxu1 %v1428_v7  ;;  %v1413_v7 = vld [vmem:[%s4806_s3 + $0xe0] sm:$0xff] }
  0x50   :  { %2321 = vmatmul.mubr.msk.f32.gmra.mxu0 %vm100_vm0, %v3002_v4  ;;  %2345 = vmatmul.mubr.msk.f32.gmra.mxu1 %vm100_vm0, %v2851_v45 }
  0x51   :  { %959 = vrot.lane.b32.xlu0 %v32_v2, %s2566_s29  ;;  %769 = vrot.lane.b32.xlu1 %v33_v5, %s2565_s26  ;;  %v41_v2 = vld [vmem:[%s4804_s0 + $0xa8] sm:$0xff] }
  0x52   :  { %369 = vmatprep.mubr.f32.mxu0 %v4809_v3  ;;  %578 = vmatprep.mubr.f32.mxu1 %v4809_v3 }
  0x53   :  { %1576 = vmatprep.subr.mxu0 %v4809_v3  ;;  %1795 = vmatprep.subr.mxu1 %v4809_v3 }
  0x54   :  { %2322 = vmatmul.mubr.msk.f32.gmra.mxu0 %vm100_vm0, %v3026_v8  ;;  %2346 = vmatmul.mubr.msk.f32.gmra.mxu1 %vm100_vm0, %v2872_v48 }
  0x55   :  { %865 = vrot.lane.b32.xlu0 %v33_v5, %s2567_s13  ;;  %961 = vrot.lane.b32.xlu1 %v33_v5, %s2566_s29 }
  0x56   :  { %375 = vmatprep.mubr.f32.mxu0 %v4809_v3  ;;  %584 = vmatprep.mubr.f32.mxu1 %v4809_v3 }
  0x57   :  { %1577 = vmatpush1.msra.mxu0 %v1392_v11  ;;  %1796 = vmatpush1.msra.mxu1 %v1427_v13  ;;  %v1412_v11 = vld [vmem:[%s4806_s3 + $0xd8] sm:$0xff] }
  0x58   :  { %2323 = vmatmul.mubr.msk.f32.gmra.mxu0 %vm100_vm0, %v3039_v9  ;;  %2347 = vmatmul.mubr.msk.f32.gmra.mxu1 %vm100_vm0, %v2888_v50 }
  0x59   :  { %771 = vrot.lane.b32.xlu0 %v34_v10, %s2565_s26  ;;  %867 = vrot.lane.b32.xlu1 %v34_v10, %s2567_s13 }
  0x5a   :  { %381 = vmatprep.mubr.f32.mxu0 %v4809_v3  ;;  %590 = vmatprep.mubr.f32.mxu1 %v4809_v3 }
  0x5b   :  { %1578 = vmatprep.subr.mxu0 %v4809_v3  ;;  %1797 = vmatprep.subr.mxu1 %v4809_v3 }
  0x5c   :  { %2324 = vmatmul.mubr.msk.f32.gmra.mxu0 %vm100_vm0, %v3063_v14  ;;  %2348 = vmatmul.mubr.msk.f32.gmra.mxu1 %vm100_vm0, %v2912_v54 }
  0x5d   :  { %963 = vrot.lane.b32.xlu0 %v34_v10, %s2566_s29  ;;  %773 = vrot.lane.b32.xlu1 %v35_v16, %s2565_s26  ;;  %v1422_v10 = vld [vmem:[%s4806_s3 + $0x128] sm:$0xff] }
  0x5e   :  { %387 = vmatprep.mubr.f32.mxu0 %v4809_v3  ;;  %596 = vmatprep.mubr.f32.mxu1 %v4809_v3 }
  0x5f   :  { %1579 = vmatpush1.msra.mxu0 %v1391_v18  ;;  %1798 = vmatpush1.msra.mxu1 %v1426_v20  ;;  %v1411_v18 = vld [vmem:[%s4806_s3 + $0xd0] sm:$0xff] }
  0x60   :  { %2325 = vmatmul.mubr.msk.f32.gmra.mxu0 %vm100_vm0, %v3079_v17  ;;  %2349 = vmatmul.mubr.msk.f32.gmra.mxu1 %vm100_vm0, %v2925_v55  ;;  %v42_v20 = vld [vmem:[%s4804_s0 + $0xb0] sm:$0xff] }
  0x61   :  { %869 = vrot.lane.b32.xlu0 %v35_v16, %s2567_s13  ;;  %965 = vrot.lane.b32.xlu1 %v35_v16, %s2566_s29 }
  0x62   :  { %393 = vmatprep.mubr.f32.mxu0 %v4809_v3  ;;  %602 = vmatprep.mubr.f32.mxu1 %v4809_v3 }
  0x63   :  { %1580 = vmatprep.subr.mxu0 %v4809_v3  ;;  %1799 = vmatprep.subr.mxu1 %v4809_v3 }
  0x64   :  { %2326 = vmatmul.mubr.msk.f32.gmra.mxu0 %vm100_vm0, %v3100_v21  ;;  %2350 = vmatmul.mubr.msk.f32.gmra.mxu1 %vm100_vm0, %v2949_v59 }
  0x65   :  { %775 = vrot.lane.b32.xlu0 %v36_v24, %s2565_s26  ;;  %871 = vrot.lane.b32.xlu1 %v36_v24, %s2567_s13 }
  0x66   :  { %399 = vmatprep.mubr.f32.mxu0 %v4809_v3  ;;  %608 = vmatprep.mubr.f32.mxu1 %v4809_v3 }
  0x67   :  { %1581 = vmatpush1.msra.mxu0 %v1390_v29  ;;  %1800 = vmatpush1.msra.mxu1 %v1425_v32  ;;  %v1410_v29 = vld [vmem:[%s4806_s3 + $0xc8] sm:$0xff]  ;;  %v1421_v32 = vld [vmem:[%s4806_s3 + $0x120] sm:$0xff] }
  0x68   :  { %2327 = vmatmul.mubr.msk.f32.gmra.mxu0 %vm100_vm0, %v3116_v25  ;;  %2351 = vmatmul.mubr.msk.f32.gmra.mxu1 %vm100_vm0, %v2965_v61 }
  0x69   :  { %967 = vrot.lane.b32.xlu0 %v36_v24, %s2566_s29  ;;  %777 = vrot.lane.b32.xlu1 %v37_v28, %s2565_s26 }
  0x6a   :  { %614 = vmatprep.mubr.f32.mxu1 %v4809_v3  ;;  %1582 = vmatprep.subr.mxu0 %v4809_v3 }
  0x6b   :  { %1583 = vmatpush1.msra.mxu0 %v1389_v33  ;;  %1801 = vmatprep.subr.mxu1 %v4809_v3  ;;  %v1409_v33 = vld [vmem:[%s4806_s3 + $0xc0] sm:$0xff] }
  0x6c   :  { %2352 = vmatmul.mubr.msk.f32.gmra.mxu1 %vm100_vm0, %v2986_v0  ;;  %1584 = vmatprep.subr.mxu0 %v4809_v3 }
  0x6d   :  { %873 = vrot.lane.b32.xlu0 %v37_v28, %s2567_s13  ;;  %969 = vrot.lane.b32.xlu1 %v37_v28, %s2566_s29 }
  0x6e   :  { %620 = vmatprep.mubr.f32.mxu1 %v4809_v3  ;;  %1585 = vmatpush1.msra.mxu0 %v1388_v34  ;;  %v43_v34 = vld [vmem:[%s4804_s0 + $0xb8] sm:$0xff] }
  0x6f   :  { %1586 = vmatprep.subr.mxu0 %v4809_v3  ;;  %1802 = vmatpush1.msra.mxu1 %v1424_v41  ;;  %v1408_v41 = vld [vmem:[%s4806_s3 + $0xb8] sm:$0xff] }
  0x70   :  { %2353 = vmatmul.mubr.msk.f32.gmra.mxu1 %vm100_vm0, %v3002_v4  ;;  %1587 = vmatpush1.msra.mxu0 %v1387_v40 }
  0x71   :  { %779 = vrot.lane.b32.xlu0 %v38_v37, %s2565_s26  ;;  %875 = vrot.lane.b32.xlu1 %v38_v37, %s2567_s13 }
  0x72   :  { %626 = vmatprep.mubr.f32.mxu1 %v4809_v3  ;;  %1588 = vmatprep.subr.mxu0 %v4809_v3 }
  0x73   :  { %1589 = vmatpush1.msra.mxu0 %v1386_v42  ;;  %1803 = vmatprep.subr.mxu1 %v4809_v3 }
  0x74   :  { %2354 = vmatmul.mubr.msk.f32.gmra.mxu1 %vm100_vm0, %v3026_v8  ;;  %1590 = vmatprep.subr.mxu0 %v4809_v3 }
  0x75   :  { %971 = vrot.lane.b32.xlu0 %v38_v37, %s2566_s29  ;;  %781 = vrot.lane.b32.xlu1 %v39_v44, %s2565_s26  ;;  %v744_v47 = vpop.permute.xlu0 %743 }
  0x76   :  { %632 = vmatprep.mubr.f32.mxu1 %v4809_v3  ;;  %v936_v49 = vpop.permute.xlu1 %935  ;;  %1591 = vmatpush1.msra.mxu0 %v1385_v46  ;;  %v1031_v52 = vsel %vm100_vm0, %v2604_v1, %v744_v47  ;;  %v1420_v46 = vld [vmem:[%s4806_s3 + $0x118] sm:$0xff]  ;;  %v1406_v47 = vld [vmem:[%s4806_s3 + $0xa8] sm:$0xff] }
  0x77   :  { %1592 = vmatprep.subr.mxu0 %v4809_v3  ;;  %1804 = vmatpush1.msra.mxu1 %v1423_v53  ;;  %v45_v53 = vld [vmem:[%s4804_s0 + $0xc8] sm:$0xff] }
  0x78   :  { %2355 = vmatmul.mubr.msk.f32.gmra.mxu1 %vm100_vm0, %v3039_v9  ;;  %1593 = vmatpush2.msra.mxu0 %v1416_v51 }
  0x79   :  { %877 = vrot.lane.b32.xlu0 %v39_v44, %s2567_s13  ;;  %973 = vrot.lane.b32.xlu1 %v39_v44, %s2566_s29 }
  0x7a   :  { %v840_v1 = vpop.permute.xlu0 %839  ;;  %638 = vmatprep.mubr.f32.mxu1 %v4809_v3  ;;  %1594 = vmatprep.subr.mxu0 %v4809_v3 }
  0x7b   :  { %v1064_v58 = vsel %vm1063_vm1, %v1031_v52, %v840_v1  ;;  %v3205_v60 = vpop.permute.xlu1 %745  ;;  %1595 = vmatpush2.msra.mxu0 %v1415_v56  ;;  %1805 = vmatprep.subr.mxu1 %v4809_v3  ;;  %v1405_v52 = vld [vmem:[%s4806_s3 + $0xa0] sm:$0xff]  ;;  %v1404_v1 = vld [vmem:[%s4806_s3 + $0x98] sm:$0xff] }
  0x7c   :  { %v3209_v62 = vsel %vm1096_vm2, %v1064_v58, %v936_v49  ;;  %2356 = vmatmul.mubr.msk.f32.gmra.mxu1 %vm100_vm0, %v3063_v14  ;;  %1596 = vmatprep.subr.mxu0 %v4809_v3  ;;  %v1403_v58 = vld [vmem:[%s4806_s3 + $0x90] sm:$0xff] }
  0x7d   :  { %783 = vrot.lane.b32.xlu0 %v40_v57, %s2565_s26  ;;  %879 = vrot.lane.b32.xlu1 %v40_v57, %s2567_s13 }
  0x7e   :  { %644 = vmatprep.mubr.f32.mxu1 %v4809_v3  ;;  %1597 = vmatpush2.msra.mxu0 %v1414_v63 }
  0x7f   :  { %v3223_v5 = vpop.permute.xlu0 %841  ;;  %v3225_v6 = vpop.permute.xlu1 %937  ;;  %1598 = vmatprep.subr.mxu0 %v4809_v3  ;;  %1806 = vmatpush1.msra.mxu1 %v1422_v10  ;;  %v46_v10 = vld [vmem:[%s4804_s0 + $0xd0] sm:$0xff] }
  0x80   :  { %2357 = vmatmul.mubr.msk.f32.gmra.mxu1 %vm100_vm0, %v3079_v17  ;;  %1599 = vmatpush2.msra.mxu0 %v1413_v7  ;;  %v1402_v7 = vld [vmem:[%s4806_s3 + $0x88] sm:$0xff] }
  0x81   :  { %975 = vrot.lane.b32.xlu0 %v40_v57, %s2566_s29  ;;  %785 = vrot.lane.b32.xlu1 %v41_v2, %s2565_s26  ;;  %v1419_v57 = vld [vmem:[%s4806_s3 + $0x110] sm:$0xff] }
  0x82   :  { %650 = vmatprep.mubr.f32.mxu1 %v4809_v3  ;;  %1600 = vmatprep.subr.mxu0 %v4809_v3 }
  0x83   :  { %v3243_v13 = vpop.permute.xlu0 %747  ;;  %v3245_v16 = vpop.permute.xlu1 %843  ;;  %1601 = vmatpush2.msra.mxu0 %v1412_v11  ;;  %1807 = vmatprep.subr.mxu1 %v4809_v3 }
  0x84   :  { %2358 = vmatmul.mubr.msk.f32.gmra.mxu1 %vm100_vm0, %v3100_v21  ;;  %1602 = vmatprep.subr.mxu0 %v4809_v3 }
  0x85   :  { %881 = vrot.lane.b32.xlu0 %v41_v2, %s2567_s13  ;;  %977 = vrot.lane.b32.xlu1 %v41_v2, %s2566_s29  ;;  %v1418_v2 = vld [vmem:[%s4806_s3 + $0x108] sm:$0xff] }
  0x86   :  { %656 = vmatprep.mubr.f32.mxu1 %v4809_v3  ;;  %1603 = vmatpush2.msra.mxu0 %v1411_v18  ;;  %v1417_v18 = vld [vmem:[%s4806_s3 + $0x100] sm:$0xff] }
  0x87   :  { %v3260_v24 = vpop.permute.xlu0 %939  ;;  %v3262_v28 = vpop.permute.xlu1 %749  ;;  %1604 = vmatprep.subr.mxu0 %v4809_v3  ;;  %1808 = vmatpush1.msra.mxu1 %v1421_v32 }
  0x88   :  { %2359 = vmatmul.mubr.msk.f32.gmra.mxu1 %vm100_vm0, %v3116_v25  ;;  %1605 = vmatpush2.msra.mxu0 %v1410_v29  ;;  %v47_v29 = vld [vmem:[%s4804_s0 + $0xd8] sm:$0xff] }
  0x89   :  { %787 = vrot.lane.b32.xlu0 %v42_v20, %s2565_s26  ;;  %883 = vrot.lane.b32.xlu1 %v42_v20, %s2567_s13 }
  0x8a   :  { %662 = vmatprep.mubr.f32.mxu1 %v4809_v3  ;;  %1606 = vmatprep.subr.mxu0 %v4809_v3 }
  0x8b   :  { %v3283_v37 = vpop.permute.xlu0 %845  ;;  %v3285_v40 = vpop.permute.xlu1 %941  ;;  %1607 = vmatpush2.msra.mxu0 %v1409_v33  ;;  %1809 = vmatprep.subr.mxu1 %v4809_v3  ;;  %v3407_v33 = vld [vmem:[%s4806_s3 + $0x238] sm:$0xff] }
  0x8c   :  { %2360 = vmatmul.mubr.msk.f32.gmra.mxu1 %vm100_vm0, %v2647_v12  ;;  %1608 = vmatprep.subr.mxu0 %v4809_v3  ;;  %v1407_v12 = vld [vmem:[%s4806_s3 + $0xb0] sm:$0xff] }
  0x8d   :  { %979 = vrot.lane.b32.xlu0 %v42_v20, %s2566_s29  ;;  %789 = vrot.lane.b32.xlu1 %v43_v34, %s2565_s26  ;;  %v1401_v20 = vld [vmem:[%s4806_s3 + $0x80] sm:$0xff] }
  0x8e   :  { %668 = vmatprep.mubr.f32.mxu1 %v4809_v3  ;;  %1609 = vmatpush2.msra.mxu0 %v1408_v41 }
  0x8f   :  { %v3297_v42 = vpop.permute.xlu0 %751  ;;  %v3299_v44 = vpop.permute.xlu1 %847  ;;  %1610 = vmatprep.subr.mxu0 %v4809_v3  ;;  %1810 = vmatpush1.msra.mxu1 %v1420_v46  ;;  %v1446_v46 = vld [vmem:[%s4806_s3 + $0x1e8] sm:$0xff] }
  0x90   :  { %2361 = vmatmul.mubr.msk.f32.gmra.mxu1 %vm100_vm0, %v2666_v15  ;;  %v44_v15 = vld [vmem:[%s4804_s0 + $0xc0] sm:$0xff]  ;;  %1611 = vmatpush2.msra.mxu0 %v1407_v12  ;;  %v1447_v12 = vld [vmem:[%s4806_s3 + $0x1f0] sm:$0xff] }
  0x91   :  { %885 = vrot.lane.b32.xlu0 %v43_v34, %s2567_s13  ;;  %981 = vrot.lane.b32.xlu1 %v43_v34, %s2566_s29  ;;  %v1448_v34 = vld [vmem:[%s4806_s3 + $0x1f8] sm:$0xff] }
  0x92   :  { %674 = vmatprep.mubr.f32.mxu1 %v4809_v3  ;;  %1612 = vmatprep.subr.mxu0 %v4809_v3 }
  0x93   :  { %v3320_v49 = vpop.permute.xlu0 %943  ;;  %v3322_v51 = vpop.permute.xlu1 %753  ;;  %1613 = vmatpush2.msra.mxu0 %v1406_v47  ;;  %1811 = vmatprep.subr.mxu1 %v4809_v3  ;;  %v48_v47 = vld [vmem:[%s4804_s0 + $0xe0] sm:$0xff] }
  0x94   :  { %2362 = vmatmul.mubr.msk.f32.gmra.mxu1 %vm100_vm0, %v2691_v19  ;;  %1614 = vmatprep.subr.mxu0 %v4809_v3 }
  0x95   :  { %791 = vrot.lane.b32.xlu0 %v44_v15, %s2565_s26  ;;  %887 = vrot.lane.b32.xlu1 %v44_v15, %s2567_s13 }
  0x96   :  { %680 = vmatprep.mubr.f32.mxu1 %v4809_v3  ;;  %1615 = vmatpush2.msra.mxu0 %v1405_v52 }
  0x97   :  { %v3337_v56 = vpop.permute.xlu0 %849  ;;  %v3339_v19 = vpop.permute.xlu1 %945  ;;  %1616 = vmatprep.subr.mxu0 %v4809_v3  ;;  %1812 = vmatpush1.msra.mxu1 %v1419_v57 }
  0x98   :  { %2363 = vmatmul.mubr.msk.f32.gmra.mxu1 %vm100_vm0, %v2715_v23  ;;  %1617 = vmatpush2.msra.mxu0 %v1404_v1 }
  0x99   :  { %983 = vrot.lane.b32.xlu0 %v44_v15, %s2566_s29  ;;  %793 = vrot.lane.b32.xlu1 %v45_v53, %s2565_s26 }
  0x9a   :  { %686 = vmatprep.mubr.f32.mxu1 %v4809_v3  ;;  %1618 = vmatprep.subr.mxu0 %v4809_v3 }
  0x9b   :  { %v3357_v63 = vpop.permute.xlu0 %755  ;;  %v3359_v23 = vpop.permute.xlu1 %851  ;;  %1619 = vmatpush2.msra.mxu0 %v1403_v58  ;;  %1813 = vmatprep.subr.mxu1 %v4809_v3  ;;  %v1444_v58 = vld [vmem:[%s4806_s3 + $0x1d8] sm:$0xff] }
  0x9c   :  { %2364 = vmatmul.mubr.msk.f32.gmra.mxu1 %vm100_vm0, %v2739_v27  ;;  %1620 = vmatprep.subr.mxu0 %v4809_v3 }
  0x9d   :  { %889 = vrot.lane.b32.xlu0 %v45_v53, %s2567_s13  ;;  %985 = vrot.lane.b32.xlu1 %v45_v53, %s2566_s29  ;;  %v49_v53 = vld [vmem:[%s4804_s0 + $0xe8] sm:$0xff] }
  0x9e   :  { %692 = vmatprep.mubr.f32.mxu1 %v4809_v3  ;;  %1814 = vmatpush1.msra.mxu1 %v1418_v2  ;;  %v1443_v2 = vld [vmem:[%s4806_s3 + $0x1d0] sm:$0xff] }
  0x9f   :  { %v3377_v27 = vpop.permute.xlu0 %947  ;;  %v3379_v11 = vpop.permute.xlu1 %757  ;;  %1621 = vmatpush2.msra.mxu0 %v1402_v7  ;;  %1815 = vmatprep.subr.mxu1 %v4809_v3 }
  0xa0   :  { %2365 = vmatmul.mubr.msk.f32.gmra.mxu1 %vm100_vm0, %v2763_v31  ;;  %1622 = vmatprep.subr.mxu0 %v4809_v3 }
  0xa1   :  { %795 = vrot.lane.b32.xlu0 %v46_v10, %s2565_s26  ;;  %891 = vrot.lane.b32.xlu1 %v46_v10, %s2567_s13 }
  0xa2   :  { %698 = vmatprep.mubr.f32.mxu1 %v4809_v3  ;;  %1816 = vmatpush1.msra.mxu1 %v1417_v18  ;;  %v1442_v18 = vld [vmem:[%s4806_s3 + $0x1c8] sm:$0xff] }
  0xa3   :  { %v3397_v31 = vpop.permute.xlu0 %853  ;;  %v3399_v32 = vpop.permute.xlu1 %949  ;;  %1623 = vmatpush2.msra.mxu0 %v1401_v20  ;;  %1817 = vmatprep.subr.mxu1 %v4809_v3  ;;  %v50_v20 = vld [vmem:[%s4804_s0 + $0xf0] sm:$0xff] }
  0xa4   :  { %2366 = vmatmul.mubr.msk.f32.gmra.mxu1 %vm100_vm0, %v2791_v36  ;;  %2441 = vmatprep.subr.mxu0 %v3407_v33 }
  0xa5   :  { %987 = vrot.lane.b32.xlu0 %v46_v10, %s2566_s29  ;;  %797 = vrot.lane.b32.xlu1 %v47_v29, %s2565_s26 }
  0xa6   :  { %704 = vmatprep.mubr.f32.mxu1 %v4809_v3  ;;  %1818 = vmatpush2.msra.mxu1 %v1448_v34 }
  0xa7   :  { %v3416_v41 = vpop.permute.xlu0 %759  ;;  %v3418_v36 = vpop.permute.xlu1 %855  ;;  %1819 = vmatprep.subr.mxu1 %v4809_v3 }
  0xa8   :  { %2367 = vmatmul.mubr.msk.f32.gmra.mxu1 %vm100_vm0, %v2812_v39  ;;  %v1445_v39 = vld [vmem:[%s4806_s3 + $0x1e0] sm:$0xff] }
  0xa9   :  { %893 = vrot.lane.b32.xlu0 %v47_v29, %s2567_s13  ;;  %989 = vrot.lane.b32.xlu1 %v47_v29, %s2566_s29 }
  0xaa   :  { %1820 = vmatpush2.msra.mxu1 %v1447_v12  ;;  %v1441_v12 = vld [vmem:[%s4806_s3 + $0x1c0] sm:$0xff] }
  0xab   :  { %v3435_v15 = vpop.permute.xlu0 %951  ;;  %v3437_v52 = vpop.permute.xlu1 %761  ;;  %1821 = vmatprep.subr.mxu1 %v4809_v3 }
  0xac   :  { %1822 = vmatpush2.msra.mxu1 %v1446_v46  ;;  %v1440_v46 = vld [vmem:[%s4806_s3 + $0x1b8] sm:$0xff] }
  0xad   :  { %799 = vrot.lane.b32.xlu0 %v48_v47, %s2565_s26  ;;  %895 = vrot.lane.b32.xlu1 %v48_v47, %s2567_s13 }
  0xae   :  { %1823 = vmatprep.subr.mxu1 %v4809_v3 }
  0xaf   :  { %v3449_v1 = vpop.permute.xlu0 %857  ;;  %v3451_v57 = vpop.permute.xlu1 %953  ;;  %1824 = vmatpush2.msra.mxu1 %v1445_v39 }
  0xb0   :  { %1825 = vmatprep.subr.mxu1 %v4809_v3 }
  0xb1   :  { %991 = vrot.lane.b32.xlu0 %v48_v47, %s2566_s29  ;;  %801 = vrot.lane.b32.xlu1 %v49_v53, %s2565_s26  ;;  %v51_v47 = vld [vmem:[%s4804_s0 + $0xf8] sm:$0xff] }
  0xb2   :  { %1826 = vmatpush2.msra.mxu1 %v1444_v58  ;;  %v1439_v58 = vld [vmem:[%s4806_s3 + $0x1b0] sm:$0xff] }
  0xb3   :  { %v3462_v7 = vpop.permute.xlu0 %763  ;;  %v3464_v10 = vpop.permute.xlu1 %859  ;;  %1827 = vmatprep.subr.mxu1 %v4809_v3 }
  0xb4   :  { %1828 = vmatpush2.msra.mxu1 %v1443_v2 }
  0xb5   :  { %897 = vrot.lane.b32.xlu0 %v49_v53, %s2567_s13  ;;  %993 = vrot.lane.b32.xlu1 %v49_v53, %s2566_s29 }
  0xb6   :  { %1829 = vmatprep.subr.mxu1 %v4809_v3 }
  0xb7   :  { %v3476_v29 = vpop.permute.xlu0 %955  ;;  %v3478_v34 = vpop.permute.xlu1 %765  ;;  %1830 = vmatpush2.msra.mxu1 %v1442_v18 }
  0xb8   :  { %1831 = vmatprep.subr.mxu1 %v4809_v3 }
  0xb9   :  { %803 = vrot.lane.b32.xlu0 %v50_v20, %s2565_s26  ;;  %899 = vrot.lane.b32.xlu1 %v50_v20, %s2567_s13 }
  0xba   :  { %1832 = vmatpush2.msra.mxu1 %v1441_v12  ;;  %v1438_v12 = vld [vmem:[%s4806_s3 + $0x1a8] sm:$0xff] }
  0xbb   :  { %v3492_v39 = vpop.permute.xlu0 %861  ;;  %v3494_v53 = vpop.permute.xlu1 %957  ;;  %1833 = vmatprep.subr.mxu1 %v4809_v3 }
  0xbc   :  { %4820 = vst [vmem:[#allocation2_spill] sm:$0xff] %v3494_v53  ;;  %1834 = vmatpush2.msra.mxu1 %v1440_v46 }
  0xbd   :  { %995 = vrot.lane.b32.xlu0 %v50_v20, %s2566_s29  ;;  %805 = vrot.lane.b32.xlu1 %v51_v47, %s2565_s26  ;;  %v1437_v20 = vld [vmem:[%s4806_s3 + $0x1a0] sm:$0xff] }
  0xbe   :  { %1835 = vmatprep.subr.mxu1 %v4809_v3 }
  0xbf   :  { %v3503_v2 = vpop.permute.xlu0 %767  ;;  %v3505_v18 = vpop.permute.xlu1 %863  ;;  %1836 = vmatpush2.msra.mxu1 %v1439_v58  ;;  %v1436_v58 = vld [vmem:[%s4806_s3 + $0x198] sm:$0xff] }
  0xc0   :  { %4821 = vst [vmem:[#allocation3_spill] sm:$0xff] %v3503_v2  ;;  %4822 = vst [vmem:[#allocation4_spill] sm:$0xff] %v3505_v18  ;;  %1837 = vmatprep.subr.mxu1 %v4809_v3 }
  0xc1   :  { %901 = vrot.lane.b32.xlu0 %v51_v47, %s2567_s13  ;;  %997 = vrot.lane.b32.xlu1 %v51_v47, %s2566_s29  ;;  %v2517_v47 = vld [vmem:[%s4805_s1] sm:$0xff] }
  0xc2   :  { %1838 = vmatpush2.msra.mxu1 %v1438_v12  ;;  %v2518_v12 = vld [vmem:[%s4805_s1 + $0x8] sm:$0xff] }
  0xc3   :  { %v3516_v46 = vpop.permute.xlu0 %959  ;;  %v3518_v53 = vpop.permute.xlu1 %769  ;;  %1839 = vmatprep.subr.mxu1 %v4809_v3 }
  0xc4   :  { %4823 = vst [vmem:[#allocation5_spill] sm:$0xff] %v3516_v46  ;;  %4824 = vst [vmem:[#allocation6_spill] sm:$0xff] %v3518_v53  ;;  %1840 = vmatpush2.msra.mxu1 %v1437_v20  ;;  %v1435_v53 = vld [vmem:[%s4806_s3 + $0x190] sm:$0xff] }
  0xc5   :  { %1257 = vrot.lane.b32.xlu0 %v2517_v47, %s2565_s26  ;;  %1259 = vrot.lane.b32.xlu1 %v2518_v12, %s2565_s26  ;;  %v2519_v47 = vld [vmem:[%s4805_s1 + $0x10] sm:$0xff]  ;;  %v1434_v12 = vld [vmem:[%s4806_s3 + $0x188] sm:$0xff] }
  0xc6   :  { %1841 = vmatprep.subr.mxu1 %v4809_v3 }
  0xc7   :  { %v3533_v46 = vpop.permute.xlu0 %865  ;;  %v3535_v20 = vpop.permute.xlu1 %961  ;;  %1842 = vmatpush2.msra.mxu1 %v1436_v58 }
  0xc8   :  { %4825 = vst [vmem:[#allocation7_spill] sm:$0xff] %v3533_v46  ;;  %4826 = vst [vmem:[#allocation8_spill] sm:$0xff] %v3535_v20  ;;  %1843 = vmatprep.subr.mxu1 %v4809_v3  ;;  %v2520_v46 = vld [vmem:[%s4804_s0 + $0x8] sm:$0xff] }
  0xc9   :  { %1261 = vrot.lane.b32.xlu0 %v2519_v47, %s2565_s26  ;;  %1263 = vrot.lane.b32.xlu1 %v2710_v22, %s2565_s26  ;;  %v1032_v47 = vsel %vm100_vm0, %v2520_v46, %v3205_v60 }
  0xca   :  { %1844 = vmatpush2.msra.mxu1 %v1435_v53  ;;  %v1433_v53 = vld [vmem:[%s4806_s3 + $0x180] sm:$0xff]  ;;  %v1065_v60 = vsel %vm1063_vm1, %v1032_v47, %v3223_v5 }
  0xcb   :  { %v3550_v58 = vpop.permute.xlu0 %771  ;;  %v3552_v20 = vpop.permute.xlu1 %867  ;;  %1845 = vmatprep.subr.mxu1 %v4809_v3  ;;  %v3594_v5 = vsel %vm1096_vm2, %v1065_v60, %v3225_v6  ;;  %v2522_v6 = vld [vmem:[%s4804_s0 + $0x18] sm:$0xff] }
  0xcc   :  { %4827 = vst [vmem:[#allocation9_spill] sm:$0xff] %v3550_v58  ;;  %4828 = vst [vmem:[#allocation10_spill] sm:$0xff] %v3552_v20  ;;  %v263_v18 = vpop.f32.mrf.mxu0  ;;  %v3560_v22 = vpop.f32.mrf.mxu1  ;;  %1846 = vmatpush2.msra.mxu1 %v1434_v12  ;;  %v4831_v58 = vmov 0.0  }
  0xcd   :  { %4829 = vst [vmem:[#allocation11_spill] sm:$0xff] %v3560_v22  ;;  %1265 = vrot.lane.b32.xlu0 %v2734_v26, %s2565_s26  ;;  %1267 = vrot.lane.b32.xlu1 %v2758_v30, %s2565_s26  ;;  %v2521_v26 = vld [vmem:[%s4804_s0 + $0x10] sm:$0xff] }
  0xce   :  { %v265_v3 = vpop.f32.mrf.mxu0  ;;  %v3569_v20 = vpop.f32.mrf.mxu1  ;;  %1847 = vmatprep.subr.mxu1 %v4831_v58  ;;  %v1033_v30 = vsel %vm100_vm0, %v2521_v26, %v3243_v13 }
  0xcf   :  { %4830 = vst [vmem:[#allocation12_spill] sm:$0xff] %v3569_v20  ;;  %v1130_v46 = vmul.f32 %v3209_v62, %v265_v3  ;;  %v3575_v12 = vpop.permute.xlu0 %963  ;;  %v3577_v22 = vpop.permute.xlu1 %773  ;;  %1848 = vmatpush2.msra.mxu1 %v1433_v53  ;;  %v1129_v20 = vmul.f32 %v3209_v62, %v263_v18  ;;  %v1455_v3 = vld [vmem:[%s4806_s3 + $0x230] sm:$0xff]  ;;  %v1066_v13 = vsel %vm1063_vm1, %v1033_v30, %v3245_v16  ;;  %v1454_v16 = vld [vmem:[%s4806_s3 + $0x228] sm:$0xff] }
  0xd0   :  { %v269_v58 = vpop.f32.mrf.mxu0  ;;  %v3585_v2 = vpop.f32.mrf.mxu1 }
  0xd1   :  { %1624 = vmatprep.mubr.f32.mxu0 %v1130_v46  ;;  %1269 = vrot.lane.b32.xlu0 %v2786_v35, %s2565_s26 }
  0xd2   :  { %v271_v47 = vpop.f32.mrf.mxu0  ;;  %v3596_v53 = vpop.f32.mrf.mxu1  ;;  %1625 = vmatmul.mubr.f32.vlgmr.msra.gmra.mxu0 %v1129_v20  ;;  %1271 = vrot.lane.b32.xlu1 %v2807_v38, %s2565_s26  ;;  %v1034_v20 = vsel %vm100_vm0, %v2522_v6, %v3262_v28  ;;  %v1133_v38 = vmul.f32 %v3594_v5, %v269_v58  ;;  %v1453_v28 = vld [vmem:[%s4806_s3 + $0x220] sm:$0xff] }
  0xd3   :  { %v1134_v18 = vmul.f32 %v3594_v5, %v271_v47  ;;  %2442 = vmatpush3.msra.mxu0 %v3407_v33  ;;  %v3604_v46 = vpop.permute.xlu0 %869  ;;  %v3606_v35 = vpop.permute.xlu1 %965  ;;  %v3621_v33 = vsel %vm1096_vm2, %v1066_v13, %v3260_v24  ;;  %v1067_v58 = vsel %vm1063_vm1, %v1034_v20, %v3283_v37 }
  0xd4   :  { %v275_v60 = vpop.f32.mrf.mxu0  ;;  %v3614_v26 = vpop.f32.mrf.mxu1  ;;  %2443 = vmatprep.subr.mxu0 %v1455_v3 }
  0xd5   :  { %4832 = vst [vmem:[#allocation13_spill] sm:$0xff] %v3614_v26  ;;  %1629 = vmatprep.mubr.f32.mxu0 %v1134_v18  ;;  %2444 = vmatpush3.msra.mxu0 %v1455_v3  ;;  %v1137_v6 = vmul.f32 %v3621_v33, %v275_v60 }
  0xd6   :  { %v277_v30 = vpop.f32.mrf.mxu0  ;;  %v3623_v47 = vpop.f32.mrf.mxu1  ;;  %1630 = vmatmul.mubr.f32.gmra.mxu0 %v1133_v38  ;;  %1273 = vrot.lane.b32.xlu0 %v2835_v43, %s2565_s26  ;;  %v2523_v43 = vld [vmem:[%s4804_s0 + $0x20] sm:$0xff]  ;;  %v3652_v38 = vsel %vm1096_vm2, %v1067_v58, %v3285_v40  ;;  %v3670_v40 = vld [vmem:[%s4804_s0 + $0x28] sm:$0xff] }
  0xd7   :  { %v1138_v3 = vmul.f32 %v3621_v33, %v277_v30  ;;  %v3633_v18 = vpop.permute.xlu0 %775  ;;  %v3635_v24 = vpop.permute.xlu1 %871  ;;  %1275 = vrot.lane.b32.xlu1 %v2851_v45, %s2565_s26  ;;  %2445 = vmatprep.subr.mxu0 %v1454_v16  ;;  %v1035_v13 = vsel %vm100_vm0, %v2523_v43, %v3297_v42  ;;  %v1452_v45 = vld [vmem:[%s4806_s3 + $0x218] sm:$0xff]  ;;  %4833 = vst [vmem:[#allocation14_spill] sm:$0xff] %v3670_v40 }
  0xd8   :  { %v281_v37 = vpop.f32.mrf.mxu0  ;;  %v3645_v20 = vpop.f32.mrf.mxu1  ;;  %2446 = vmatpush3.msra.mxu0 %v1454_v16  ;;  %v1068_v42 = vsel %vm1063_vm1, %v1035_v13, %v3299_v44 }
  0xd9   :  { %1634 = vmatprep.mubr.f32.mxu0 %v1138_v3  ;;  %2447 = vmatprep.subr.mxu0 %v1453_v28  ;;  %v1141_v44 = vmul.f32 %v3652_v38, %v281_v37 }
  0xda   :  { %v283_v30 = vpop.f32.mrf.mxu0  ;;  %v3654_v26 = vpop.f32.mrf.mxu1  ;;  %1635 = vmatmul.mubr.f32.gmra.mxu0 %v1137_v6  ;;  %1277 = vrot.lane.b32.xlu0 %v2872_v48, %s2565_s26  ;;  %v1036_v48 = vsel %vm100_vm0, %v3670_v40, %v3322_v51  ;;  %v1450_v51 = vld [vmem:[%s4806_s3 + $0x208] sm:$0xff] }
  0xdb   :  { %v1142_v60 = vmul.f32 %v3652_v38, %v283_v30  ;;  %v3661_v16 = vpop.permute.xlu0 %967  ;;  %v3663_v3 = vpop.permute.xlu1 %777  ;;  %1279 = vrot.lane.b32.xlu1 %v2888_v50, %s2565_s26  ;;  %2448 = vmatpush3.msra.mxu0 %v1453_v28  ;;  %v1451_v50 = vld [vmem:[%s4806_s3 + $0x210] sm:$0xff]  ;;  %v3683_v28 = vsel %vm1096_vm2, %v1068_v42, %v3320_v49  ;;  %v1069_v37 = vsel %vm1063_vm1, %v1036_v48, %v3337_v56 }
  0xdc   :  { %v287_v58 = vpop.f32.mrf.mxu0  ;;  %v3676_v43 = vpop.f32.mrf.mxu1  ;;  %2449 = vmatprep.subr.mxu0 %v1452_v45 }
  0xdd   :  { %1639 = vmatprep.mubr.f32.mxu0 %v1142_v60  ;;  %2450 = vmatpush3.msra.mxu0 %v1452_v45  ;;  %v1145_v56 = vmul.f32 %v3683_v28, %v287_v58 }
  0xde   :  { %v289_v13 = vpop.f32.mrf.mxu0  ;;  %v3685_v6 = vpop.f32.mrf.mxu1  ;;  %1640 = vmatmul.mubr.f32.gmra.mxu0 %v1141_v44  ;;  %1281 = vrot.lane.b32.xlu0 %v2912_v54, %s2565_s26  ;;  %v3704_v54 = vld [vmem:[%s4804_s0 + $0x30] sm:$0xff]  ;;  %v3717_v44 = vsel %vm1096_vm2, %v1069_v37, %v3339_v19  ;;  %v3735_v19 = vld [vmem:[%s4804_s0 + $0x38] sm:$0xff] }
  0xdf   :  { %v1146_v45 = vmul.f32 %v3683_v28, %v289_v13  ;;  %v3695_v30 = vpop.permute.xlu0 %873  ;;  %v3697_v49 = vpop.permute.xlu1 %969  ;;  %1283 = vrot.lane.b32.xlu1 %v2925_v55, %s2565_s26  ;;  %2451 = vmatprep.subr.mxu0 %v1451_v50  ;;  %4834 = vst [vmem:[#allocation15_spill] sm:$0xff] %v3704_v54  ;;  %v1037_v42 = vsel %vm100_vm0, %v3704_v54, %v3357_v63  ;;  %v1449_v55 = vld [vmem:[%s4806_s3 + $0x200] sm:$0xff]  ;;  %4835 = vst [vmem:[#allocation16_spill] sm:$0xff] %v3735_v19 }
  0xe0   :  { %v293_v60 = vpop.f32.mrf.mxu0  ;;  %v3710_v48 = vpop.f32.mrf.mxu1  ;;  %2452 = vmatpush3.msra.mxu0 %v1451_v50  ;;  %v1070_v63 = vsel %vm1063_vm1, %v1037_v42, %v3359_v23 }
  0xe1   :  { %1644 = vmatprep.mubr.f32.mxu0 %v1146_v45  ;;  %2453 = vmatprep.subr.mxu0 %v1450_v51  ;;  %v1149_v23 = vmul.f32 %v3717_v44, %v293_v60 }
  0xe2   :  { %v295_v13 = vpop.f32.mrf.mxu0  ;;  %v3719_v40 = vpop.f32.mrf.mxu1  ;;  %1645 = vmatmul.mubr.f32.gmra.mxu0 %v1145_v56  ;;  %1285 = vrot.lane.b32.xlu0 %v2949_v59, %s2565_s26  ;;  %v1038_v59 = vsel %vm100_vm0, %v3735_v19, %v3379_v11 }
  0xe3   :  { %v1150_v58 = vmul.f32 %v3717_v44, %v295_v13  ;;  %v3726_v50 = vpop.permute.xlu0 %779  ;;  %v3728_v45 = vpop.permute.xlu1 %875  ;;  %1287 = vrot.lane.b32.xlu1 %v2965_v61, %s2565_s26  ;;  %2454 = vmatpush3.msra.mxu0 %v1450_v51  ;;  %v3745_v61 = vsel %vm1096_vm2, %v1070_v63, %v3377_v27  ;;  %v1071_v11 = vsel %vm1063_vm1, %v1038_v59, %v3397_v31  ;;  %v3763_v27 = vld [vmem:[%s4804_s0 + $0x40] sm:$0xff] }
  0xe4   :  { %v299_v37 = vpop.f32.mrf.mxu0  ;;  %v3741_v42 = vpop.f32.mrf.mxu1  ;;  %2455 = vmatprep.subr.mxu0 %v1449_v55  ;;  %4836 = vst [vmem:[#allocation17_spill] sm:$0xff] %v3763_v27  ;;  %v3773_v59 = vsel %vm1096_vm2, %v1071_v11, %v3399_v32  ;;  %v3791_v32 = vld [vmem:[%s4804_s0 + $0x48] sm:$0xff] }
  0xe5   :  { %1649 = vmatprep.mubr.f32.mxu0 %v1150_v58  ;;  %2456 = vmatpush3.msra.mxu0 %v1449_v55  ;;  %v1153_v31 = vmul.f32 %v3745_v61, %v299_v37  ;;  %4839 = vst [vmem:[#allocation20_spill] sm:$0xff] %v3791_v32 }
  0xe6   :  { %v301_v51 = vpop.f32.mrf.mxu0  ;;  %v3747_v56 = vpop.f32.mrf.mxu1  ;;  %1650 = vmatmul.mubr.f32.gmra.mxu0 %v1149_v23  ;;  %1289 = vrot.lane.b32.xlu0 %v2986_v0, %s2565_s26  ;;  %v1039_v0 = vsel %vm100_vm0, %v3763_v27, %v3416_v41 }
  0xe7   :  { %v1154_v60 = vmul.f32 %v3745_v61, %v301_v51  ;;  %v3754_v13 = vpop.permute.xlu0 %971  ;;  %v3756_v58 = vpop.permute.xlu1 %781  ;;  %1291 = vrot.lane.b32.xlu1 %v3002_v4, %s2565_s26  ;;  %v1072_v41 = vsel %vm1063_vm1, %v1039_v0, %v3418_v36 }
  0xe8   :  { %v305_v55 = vpop.f32.mrf.mxu0  ;;  %v3769_v63 = vpop.f32.mrf.mxu1  ;;  %v3799_v0 = vsel %vm1096_vm2, %v1072_v41, %v3435_v15  ;;  %v3816_v15 = vld [vmem:[%s4804_s0 + $0x50] sm:$0xff] }
  0xe9   :  { %4837 = vst [vmem:[#allocation18_spill] sm:$0xff] %v3769_v63  ;;  %1654 = vmatprep.mubr.f32.mxu0 %v1154_v60  ;;  %v1157_v36 = vmul.f32 %v3773_v59, %v305_v55  ;;  %4840 = vst [vmem:[#allocation21_spill] sm:$0xff] %v3816_v15  ;;  %v4852_v63 = vld [vmem:[#allocation10_spill] sm:$0xff] }
  0xea   :  { %v307_v4 = vpop.f32.mrf.mxu0  ;;  %v3775_v23 = vpop.f32.mrf.mxu1  ;;  %1655 = vmatmul.mubr.f32.gmra.mxu0 %v1153_v31  ;;  %1293 = vrot.lane.b32.xlu0 %v3026_v8, %s2565_s26  ;;  %v1040_v8 = vsel %vm100_vm0, %v3791_v32, %v3437_v52 }
  0xeb   :  { %4838 = vst [vmem:[#allocation19_spill] sm:$0xff] %v3775_v23  ;;  %v1158_v37 = vmul.f32 %v3773_v59, %v307_v4  ;;  %v3782_v51 = vpop.permute.xlu0 %877  ;;  %v3784_v27 = vpop.permute.xlu1 %973  ;;  %1295 = vrot.lane.b32.xlu1 %v3039_v9, %s2565_s26  ;;  %v1073_v4 = vsel %vm1063_vm1, %v1040_v8, %v3449_v1 }
  0xec   :  { %v311_v11 = vpop.f32.mrf.mxu0  ;;  %v520_v60 = vpop.f32.mrf.mxu1 }
  0xed   :  { %1659 = vmatprep.mubr.f32.mxu0 %v1158_v37  ;;  %v1161_v1 = vmul.f32 %v3799_v0, %v311_v11  ;;  %v1131_v41 = vmul.f32 %v3209_v62, %v520_v60 }
  0xee   :  { %v313_v31 = vpop.f32.mrf.mxu0  ;;  %v522_v9 = vpop.f32.mrf.mxu1  ;;  %1660 = vmatmul.mubr.f32.gmra.mxu0 %v1157_v36  ;;  %1297 = vrot.lane.b32.xlu0 %v3063_v14, %s2565_s26  ;;  %v1041_v14 = vsel %vm100_vm0, %v3816_v15, %v3462_v7  ;;  %v4849_v15 = vld [vmem:[#allocation7_spill] sm:$0xff] }
  0xef   :  { %v1162_v52 = vmul.f32 %v3799_v0, %v313_v31  ;;  %v1132_v55 = vmul.f32 %v3209_v62, %v522_v9  ;;  %v3807_v32 = vpop.permute.xlu0 %783  ;;  %v3809_v37 = vpop.permute.xlu1 %879  ;;  %1299 = vrot.lane.b32.xlu1 %v3079_v17, %s2565_s26  ;;  %v3825_v17 = vsel %vm1096_vm2, %v1073_v4, %v3451_v57  ;;  %v1074_v19 = vsel %vm1063_vm1, %v1041_v14, %v3464_v10  ;;  %v3842_v57 = vld [vmem:[%s4804_s0 + $0x58] sm:$0xff] }
  0xf0   :  { %v317_v8 = vpop.f32.mrf.mxu0  ;;  %v526_v36 = vpop.f32.mrf.mxu1  ;;  %4841 = vst [vmem:[#allocation22_spill] sm:$0xff] %v3842_v57  ;;  %v1042_v10 = vsel %vm100_vm0, %v3842_v57, %v3478_v34 }
  0xf1   :  { %1849 = vmatprep.mubr.f32.mxu1 %v1132_v55  ;;  %1664 = vmatprep.mubr.f32.mxu0 %v1162_v52  ;;  %v1165_v4 = vmul.f32 %v3825_v17, %v317_v8  ;;  %v1135_v52 = vmul.f32 %v3594_v5, %v526_v36 }
  0xf2   :  { %v319_v31 = vpop.f32.mrf.mxu0  ;;  %v528_v9 = vpop.f32.mrf.mxu1  ;;  %1665 = vmatmul.mubr.f32.gmra.mxu0 %v1161_v1  ;;  %1850 = vmatmul.mubr.f32.vlgmr.msra.gmra.mxu1 %v1131_v41  ;;  %v1075_v41 = vsel %vm1063_vm1, %v1042_v10, %v3492_v39  ;;  %v3872_v39 = vld [vmem:[%s4804_s0 + $0x60] sm:$0xff] }
  0xf3   :  { %v1166_v7 = vmul.f32 %v3825_v17, %v319_v31  ;;  %v1136_v11 = vmul.f32 %v3594_v5, %v528_v9  ;;  %v3831_v62 = vpop.permute.xlu0 %975  ;;  %v3833_v60 = vpop.permute.xlu1 %785  ;;  %1301 = vrot.lane.b32.xlu0 %v3100_v21, %s2565_s26  ;;  %1303 = vrot.lane.b32.xlu1 %v3116_v25, %s2565_s26  ;;  %v3851_v21 = vsel %vm1096_vm2, %v1074_v19, %v3476_v29  ;;  %v2531_v29 = vld [vmem:[%s4805_s1 + $0xc0] sm:$0xff]  ;;  %v2532_v19 = vld [vmem:[%s4805_s1 + $0xc8] sm:$0xff] }
  0xf4   :  { %v323_v55 = vpop.f32.mrf.mxu0  ;;  %v532_v14 = vpop.f32.mrf.mxu1  ;;  %4842 = vst [vmem:[#allocation23_spill] sm:$0xff] %v3872_v39  ;;  %v4843_v31 = vld [vmem:[#allocation3_spill] sm:$0xff] }
  0xf5   :  { %1854 = vmatprep.mubr.f32.mxu1 %v1136_v11  ;;  %1669 = vmatprep.mubr.f32.mxu0 %v1166_v7  ;;  %v1043_v9 = vsel %vm100_vm0, %v3872_v39, %v4843_v31  ;;  %v1169_v7 = vmul.f32 %v3851_v21, %v323_v55  ;;  %v1139_v11 = vmul.f32 %v3621_v33, %v532_v14 }
  0xf6   :  { %v325_v25 = vpop.f32.mrf.mxu0  ;;  %v534_v1 = vpop.f32.mrf.mxu1  ;;  %1670 = vmatmul.mubr.f32.gmra.mxu0 %v1165_v4  ;;  %1855 = vmatmul.mubr.f32.gmra.mxu1 %v1135_v52  ;;  %v4844_v52 = vld [vmem:[#allocation2_spill] sm:$0xff] }
  0xf7   :  { %v1170_v34 = vmul.f32 %v3851_v21, %v325_v25  ;;  %v1140_v8 = vmul.f32 %v3621_v33, %v534_v1  ;;  %v3857_v5 = vpop.permute.xlu0 %881  ;;  %v3859_v36 = vpop.permute.xlu1 %977  ;;  %1305 = vrot.lane.b32.xlu0 %v2531_v29, %s2565_s26  ;;  %1307 = vrot.lane.b32.xlu1 %v2532_v19, %s2565_s26  ;;  %v3881_v25 = vsel %vm1096_vm2, %v1075_v41, %v4844_v52  ;;  %v4845_v19 = vld [vmem:[#allocation4_spill] sm:$0xff] }
  0xf8   :  { %v329_v10 = vpop.f32.mrf.mxu0  ;;  %v538_v4 = vpop.f32.mrf.mxu1  ;;  %v1076_v57 = vsel %vm1063_vm1, %v1043_v9, %v4845_v19  ;;  %v2534_v41 = vld [vmem:[%s4805_s1 + $0xd0] sm:$0xff]  ;;  %v4847_v9 = vld [vmem:[#allocation6_spill] sm:$0xff]  ;;  %v4848_v19 = vld [vmem:[#allocation5_spill] sm:$0xff] }
  0xf9   :  { %1859 = vmatprep.mubr.f32.mxu1 %v1140_v8  ;;  %1674 = vmatprep.mubr.f32.mxu0 %v1170_v34  ;;  %v2535_v34 = vld [vmem:[%s4805_s1 + $0xd8] sm:$0xff]  ;;  %v3902_v8 = vld [vmem:[%s4804_s0 + $0x68] sm:$0xff]  ;;  %v1143_v52 = vmul.f32 %v3652_v38, %v538_v4 }
  0xfa   :  { %v331_v1 = vpop.f32.mrf.mxu0  ;;  %v540_v29 = vpop.f32.mrf.mxu1  ;;  %1675 = vmatmul.mubr.f32.gmra.mxu0 %v1169_v7  ;;  %1860 = vmatmul.mubr.f32.gmra.mxu1 %v1139_v11  ;;  %4846 = vst [vmem:[#allocation3_spill] sm:$0xff] %v3902_v8  ;;  %v1044_v7 = vsel %vm100_vm0, %v3902_v8, %v4847_v9  ;;  %v1173_v11 = vmul.f32 %v3881_v25, %v329_v10 }
  0xfb   :  { %v1174_v31 = vmul.f32 %v3881_v25, %v331_v1  ;;  %v1144_v55 = vmul.f32 %v3652_v38, %v540_v29  ;;  %v3887_v33 = vpop.permute.xlu0 %787  ;;  %v3889_v14 = vpop.permute.xlu1 %883  ;;  %1309 = vrot.lane.b32.xlu0 %v2534_v41, %s2565_s26  ;;  %1311 = vrot.lane.b32.xlu1 %v2535_v34, %s2565_s26  ;;  %v3911_v41 = vsel %vm1096_vm2, %v1076_v57, %v4848_v19  ;;  %v2537_v57 = vld [vmem:[%s4805_s1 + $0xe0] sm:$0xff] }
  0xfc   :  { %v335_v1 = vpop.f32.mrf.mxu0  ;;  %v544_v29 = vpop.f32.mrf.mxu1  ;;  %v1077_v54 = vsel %vm1063_vm1, %v1044_v7, %v4849_v15  ;;  %v3932_v15 = vld [vmem:[%s4804_s0 + $0x70] sm:$0xff] }
  0xfd   :  { %1864 = vmatprep.mubr.f32.mxu1 %v1144_v55  ;;  %1679 = vmatprep.mubr.f32.mxu0 %v1174_v31  ;;  %v2538_v31 = vld [vmem:[%s4805_s1 + $0xe8] sm:$0xff]  ;;  %v1177_v7 = vmul.f32 %v3911_v41, %v335_v1 }
  0xfe   :  { %v337_v34 = vpop.f32.mrf.mxu0  ;;  %v546_v39 = vpop.f32.mrf.mxu1  ;;  %1680 = vmatmul.mubr.f32.gmra.mxu0 %v1173_v11  ;;  %1865 = vmatmul.mubr.f32.gmra.mxu1 %v1143_v52  ;;  %v1147_v11 = vmul.f32 %v3683_v28, %v544_v29 }
  0xff   :  { %v1178_v9 = vmul.f32 %v3911_v41, %v337_v34  ;;  %v1148_v10 = vmul.f32 %v3683_v28, %v546_v39  ;;  %v3917_v38 = vpop.permute.xlu0 %979  ;;  %v3919_v4 = vpop.permute.xlu1 %789  ;;  %1313 = vrot.lane.b32.xlu0 %v2537_v57, %s2565_s26  ;;  %1315 = vrot.lane.b32.xlu1 %v2538_v31, %s2565_s26  ;;  %v4850_v39 = vld [vmem:[#allocation9_spill] sm:$0xff]  ;;  %v4851_v34 = vld [vmem:[#allocation8_spill] sm:$0xff] }
 0x100   :  { %v1045_v55 = vsel %vm100_vm0, %v3932_v15, %v4850_v39  ;;  %v341_v52 = vpop.f32.mrf.mxu0  ;;  %v550_v19 = vpop.f32.mrf.mxu1  ;;  %v3941_v57 = vsel %vm1096_vm2, %v1077_v54, %v4851_v34  ;;  %v2540_v54 = vld [vmem:[%s4805_s1 + $0xf0] sm:$0xff] }
 0x101   :  { %1869 = vmatprep.mubr.f32.mxu1 %v1148_v10  ;;  %1684 = vmatprep.mubr.f32.mxu0 %v1178_v9  ;;  %v1078_v23 = vsel %vm1063_vm1, %v1045_v55, %v4852_v63  ;;  %v2541_v9 = vld [vmem:[%s4805_s1 + $0xf8] sm:$0xff]  ;;  %v1181_v10 = vmul.f32 %v3941_v57, %v341_v52  ;;  %v1151_v55 = vmul.f32 %v3717_v44, %v550_v19 }
 0x102   :  { %v343_v31 = vpop.f32.mrf.mxu0  ;;  %v552_v8 = vpop.f32.mrf.mxu1  ;;  %1685 = vmatmul.mubr.f32.gmra.mxu0 %v1177_v7  ;;  %1870 = vmatmul.mubr.f32.gmra.mxu1 %v1147_v11  ;;  %v3962_v63 = vld [vmem:[%s4804_s0 + $0x78] sm:$0xff]  ;;  %v3971_v34 = vsel %vm1096_vm2, %v1078_v23, %v3575_v12  ;;  %v3984_v12 = vld [vmem:[%s4804_s0 + $0x80] sm:$0xff] }
 0x103   :  { %v1182_v39 = vmul.f32 %v3941_v57, %v343_v31  ;;  %v1152_v1 = vmul.f32 %v3717_v44, %v552_v8  ;;  %v3947_v28 = vpop.permute.xlu0 %885  ;;  %v3949_v29 = vpop.permute.xlu1 %981  ;;  %1317 = vrot.lane.b32.xlu0 %v2540_v54, %s2565_s26  ;;  %1319 = vrot.lane.b32.xlu1 %v2541_v9, %s2565_s26  ;;  %v1046_v8 = vsel %vm100_vm0, %v3962_v63, %v3577_v22 }
 0x104   :  { %v347_v7 = vpop.f32.mrf.mxu0  ;;  %v556_v11 = vpop.f32.mrf.mxu1  ;;  %v1079_v9 = vsel %vm1063_vm1, %v1046_v8, %v3604_v46  ;;  %v1047_v23 = vsel %vm100_vm0, %v3984_v12, %v3633_v18 }
 0x105   :  { %1874 = vmatprep.mubr.f32.mxu1 %v1152_v1  ;;  %1689 = vmatprep.mubr.f32.mxu0 %v1182_v39  ;;  %v1185_v39 = vmul.f32 %v3971_v34, %v347_v7  ;;  %v1155_v46 = vmul.f32 %v3745_v61, %v556_v11 }
 0x106   :  { %v349_v31 = vpop.f32.mrf.mxu0  ;;  %v558_v54 = vpop.f32.mrf.mxu1  ;;  %1690 = vmatmul.mubr.f32.gmra.mxu0 %v1181_v10  ;;  %1875 = vmatmul.mubr.f32.gmra.mxu1 %v1151_v55  ;;  %v3993_v10 = vsel %vm1096_vm2, %v1079_v9, %v3606_v35  ;;  %v4006_v35 = vld [vmem:[%s4804_s0 + $0x88] sm:$0xff] }
 0x107   :  { %v1186_v22 = vmul.f32 %v3971_v34, %v349_v31  ;;  %v1156_v52 = vmul.f32 %v3745_v61, %v558_v54  ;;  %v3977_v44 = vpop.permute.xlu0 %791  ;;  %v3979_v19 = vpop.permute.xlu1 %887  ;;  %v1080_v54 = vsel %vm1063_vm1, %v1047_v23, %v3635_v24  ;;  %v1048_v9 = vsel %vm100_vm0, %v4006_v35, %v3663_v3 }
 0x108   :  { %v353_v1 = vpop.f32.mrf.mxu0  ;;  %v562_v8 = vpop.f32.mrf.mxu1 }
 0x109   :  { %1879 = vmatprep.mubr.f32.mxu1 %v1156_v52  ;;  %1694 = vmatprep.mubr.f32.mxu0 %v1186_v22  ;;  %v1189_v22 = vmul.f32 %v3993_v10, %v353_v1  ;;  %v1159_v24 = vmul.f32 %v3773_v59, %v562_v8 }
 0x10a   :  { %v355_v55 = vpop.f32.mrf.mxu0  ;;  %v564_v31 = vpop.f32.mrf.mxu1  ;;  %1695 = vmatmul.mubr.f32.gmra.mxu0 %v1185_v39  ;;  %1880 = vmatmul.mubr.f32.gmra.mxu1 %v1155_v46  ;;  %v4015_v39 = vsel %vm1096_vm2, %v1080_v54, %v3661_v16  ;;  %v4028_v16 = vld [vmem:[%s4804_s0 + $0x90] sm:$0xff] }
 0x10b   :  { %v1190_v18 = vmul.f32 %v3993_v10, %v355_v55  ;;  %v1160_v7 = vmul.f32 %v3773_v59, %v564_v31  ;;  %v3999_v61 = vpop.permute.xlu0 %983  ;;  %v4001_v11 = vpop.permute.xlu1 %793  ;;  %v1081_v31 = vsel %vm1063_vm1, %v1048_v9, %v3695_v30  ;;  %v1049_v54 = vsel %vm100_vm0, %v4028_v16, %v3726_v50 }
 0x10c   :  { %v359_v52 = vpop.f32.mrf.mxu0  ;;  %v568_v23 = vpop.f32.mrf.mxu1 }
 0x10d   :  { %1884 = vmatprep.mubr.f32.mxu1 %v1160_v7  ;;  %1699 = vmatprep.mubr.f32.mxu0 %v1190_v18  ;;  %v1193_v18 = vmul.f32 %v4015_v39, %v359_v52  ;;  %v1163_v30 = vmul.f32 %v3799_v0, %v568_v23 }
 0x10e   :  { %v361_v46 = vpop.f32.mrf.mxu0  ;;  %v570_v55 = vpop.f32.mrf.mxu1  ;;  %1700 = vmatmul.mubr.f32.gmra.mxu0 %v1189_v22  ;;  %1885 = vmatmul.mubr.f32.gmra.mxu1 %v1159_v24  ;;  %v4037_v22 = vsel %vm1096_vm2, %v1081_v31, %v3697_v49  ;;  %v4050_v49 = vld [vmem:[%s4804_s0 + $0x98] sm:$0xff] }
 0x10f   :  { %v1194_v3 = vmul.f32 %v4015_v39, %v361_v46  ;;  %v1164_v1 = vmul.f32 %v3799_v0, %v570_v55  ;;  %v4021_v59 = vpop.permute.xlu0 %889  ;;  %v4023_v8 = vpop.permute.xlu1 %985  ;;  %v1082_v55 = vsel %vm1063_vm1, %v1049_v54, %v3728_v45  ;;  %v1050_v31 = vsel %vm100_vm0, %v4050_v49, %v3756_v58 }
 0x110   :  { %v365_v7 = vpop.f32.mrf.mxu0  ;;  %v574_v9 = vpop.f32.mrf.mxu1 }
 0x111   :  { %1704 = vmatprep.mubr.f32.mxu0 %v1194_v3  ;;  %1889 = vmatprep.mubr.f32.mxu1 %v1164_v1  ;;  %v1197_v3 = vmul.f32 %v4037_v22, %v365_v7  ;;  %v1167_v45 = vmul.f32 %v3825_v17, %v574_v9 }
 0x112   :  { %v367_v24 = vpop.f32.mrf.mxu0  ;;  %v576_v46 = vpop.f32.mrf.mxu1  ;;  %1705 = vmatmul.mubr.f32.gmra.mxu0 %v1193_v18  ;;  %1890 = vmatmul.mubr.f32.gmra.mxu1 %v1163_v30  ;;  %v4059_v18 = vsel %vm1096_vm2, %v1082_v55, %v3754_v13  ;;  %v4072_v13 = vld [vmem:[%s4804_s0 + $0xa0] sm:$0xff] }
 0x113   :  { %v1198_v50 = vmul.f32 %v4037_v22, %v367_v24  ;;  %v1168_v52 = vmul.f32 %v3825_v17, %v576_v46  ;;  %v4043_v0 = vpop.permute.xlu0 %795  ;;  %v4045_v23 = vpop.permute.xlu1 %891  ;;  %v1083_v46 = vsel %vm1063_vm1, %v1050_v31, %v3782_v51  ;;  %v1051_v55 = vsel %vm100_vm0, %v4072_v13, %v3807_v32 }
 0x114   :  { %v371_v1 = vpop.f32.mrf.mxu0  ;;  %v580_v54 = vpop.f32.mrf.mxu1 }
 0x115   :  { %1709 = vmatprep.mubr.f32.mxu0 %v1198_v50  ;;  %1894 = vmatprep.mubr.f32.mxu1 %v1168_v52  ;;  %v1201_v50 = vmul.f32 %v4059_v18, %v371_v1  ;;  %v1171_v51 = vmul.f32 %v3851_v21, %v580_v54 }
 0x116   :  { %v373_v30 = vpop.f32.mrf.mxu0  ;;  %v582_v24 = vpop.f32.mrf.mxu1  ;;  %1710 = vmatmul.mubr.f32.gmra.mxu0 %v1197_v3  ;;  %1895 = vmatmul.mubr.f32.gmra.mxu1 %v1167_v45  ;;  %v4081_v3 = vsel %vm1096_vm2, %v1083_v46, %v3784_v27  ;;  %v4094_v27 = vld [vmem:[%s4804_s0 + $0xa8] sm:$0xff] }
 0x117   :  { %v1202_v58 = vmul.f32 %v4059_v18, %v373_v30  ;;  %v1172_v7 = vmul.f32 %v3851_v21, %v582_v24  ;;  %v4065_v17 = vpop.permute.xlu0 %987  ;;  %v4067_v9 = vpop.permute.xlu1 %797  ;;  %v1084_v24 = vsel %vm1063_vm1, %v1051_v55, %v3809_v37  ;;  %v1052_v46 = vsel %vm100_vm0, %v4094_v27, %v3833_v60 }
 0x118   :  { %v377_v52 = vpop.f32.mrf.mxu0  ;;  %v586_v31 = vpop.f32.mrf.mxu1 }
 0x119   :  { %1714 = vmatprep.mubr.f32.mxu0 %v1202_v58  ;;  %1899 = vmatprep.mubr.f32.mxu1 %v1172_v7  ;;  %v1205_v58 = vmul.f32 %v4081_v3, %v377_v52  ;;  %v1175_v37 = vmul.f32 %v3881_v25, %v586_v31 }
 0x11a   :  { %v379_v45 = vpop.f32.mrf.mxu0  ;;  %v588_v30 = vpop.f32.mrf.mxu1  ;;  %1715 = vmatmul.mubr.f32.gmra.mxu0 %v1201_v50  ;;  %1900 = vmatmul.mubr.f32.gmra.mxu1 %v1171_v51  ;;  %v4103_v50 = vsel %vm1096_vm2, %v1084_v24, %v3831_v62  ;;  %v4116_v62 = vld [vmem:[%s4804_s0 + $0xb0] sm:$0xff] }
 0x11b   :  { %v1206_v32 = vmul.f32 %v4081_v3, %v379_v45  ;;  %v1176_v1 = vmul.f32 %v3881_v25, %v588_v30  ;;  %v4087_v21 = vpop.permute.xlu0 %893  ;;  %v4089_v54 = vpop.permute.xlu1 %989  ;;  %v1085_v30 = vsel %vm1063_vm1, %v1052_v46, %v3857_v5  ;;  %v1053_v24 = vsel %vm100_vm0, %v4116_v62, %v3887_v33 }
 0x11c   :  { %v383_v7 = vpop.f32.mrf.mxu0  ;;  %v592_v55 = vpop.f32.mrf.mxu1 }
 0x11d   :  { %1719 = vmatprep.mubr.f32.mxu0 %v1206_v32  ;;  %1904 = vmatprep.mubr.f32.mxu1 %v1176_v1  ;;  %v1209_v32 = vmul.f32 %v4103_v50, %v383_v7  ;;  %v1179_v5 = vmul.f32 %v3911_v41, %v592_v55 }
 0x11e   :  { %v385_v51 = vpop.f32.mrf.mxu0  ;;  %v594_v45 = vpop.f32.mrf.mxu1  ;;  %1720 = vmatmul.mubr.f32.gmra.mxu0 %v1205_v58  ;;  %1905 = vmatmul.mubr.f32.gmra.mxu1 %v1175_v37  ;;  %v4125_v58 = vsel %vm1096_vm2, %v1085_v30, %v3859_v36  ;;  %v4138_v36 = vld [vmem:[%s4804_s0 + $0xb8] sm:$0xff] }
 0x11f   :  { %v1210_v60 = vmul.f32 %v4103_v50, %v385_v51  ;;  %v1180_v52 = vmul.f32 %v3911_v41, %v594_v45  ;;  %v4109_v25 = vpop.permute.xlu0 %799  ;;  %v4111_v31 = vpop.permute.xlu1 %895  ;;  %v1086_v45 = vsel %vm1063_vm1, %v1053_v24, %v3889_v14  ;;  %4853 = vst [vmem:[#allocation2_spill] sm:$0xff] %v4138_v36  ;;  %v1054_v30 = vsel %vm100_vm0, %v4138_v36, %v3919_v4  ;;  %v4146_v14 = vld [vmem:[%s4804_s0 + $0xc0] sm:$0xff] }
 0x120   :  { %v389_v1 = vpop.f32.mrf.mxu0  ;;  %v598_v46 = vpop.f32.mrf.mxu1  ;;  %v4155_v4 = vsel %vm1096_vm2, %v1086_v45, %v3917_v38  ;;  %v1087_v36 = vsel %vm1063_vm1, %v1054_v30, %v3947_v28  ;;  %v4170_v38 = vld [vmem:[%s4804_s0 + $0xc8] sm:$0xff] }
 0x121   :  { %1724 = vmatprep.mubr.f32.mxu0 %v1210_v60  ;;  %1909 = vmatprep.mubr.f32.mxu1 %v1180_v52  ;;  %v1055_v60 = vsel %vm100_vm0, %v4146_v14, %v3977_v44  ;;  %v1213_v52 = vmul.f32 %v4125_v58, %v389_v1  ;;  %v1183_v24 = vmul.f32 %v3941_v57, %v598_v46 }
 0x122   :  { %v391_v37 = vpop.f32.mrf.mxu0  ;;  %v600_v51 = vpop.f32.mrf.mxu1  ;;  %1725 = vmatmul.mubr.f32.gmra.mxu0 %v1209_v32  ;;  %1910 = vmatmul.mubr.f32.gmra.mxu1 %v1179_v5  ;;  %v1088_v44 = vsel %vm1063_vm1, %v1055_v60, %v3979_v19  ;;  %v1056_v28 = vsel %vm100_vm0, %v4170_v38, %v4001_v11  ;;  %v4179_v60 = vsel %vm1096_vm2, %v1087_v36, %v3949_v29  ;;  %v4196_v29 = vld [vmem:[%s4804_s0 + $0xd0] sm:$0xff] }
 0x123   :  { %v1214_v33 = vmul.f32 %v4125_v58, %v391_v37  ;;  %v1184_v7 = vmul.f32 %v3941_v57, %v600_v51  ;;  %v4131_v41 = vpop.permute.xlu0 %991  ;;  %v4133_v55 = vpop.permute.xlu1 %801  ;;  %v1089_v11 = vsel %vm1063_vm1, %v1056_v28, %v4021_v59 }
 0x124   :  { %v395_v32 = vpop.f32.mrf.mxu0  ;;  %v604_v5 = vpop.f32.mrf.mxu1  ;;  %v4207_v28 = vsel %vm1096_vm2, %v1089_v11, %v4023_v8 }
 0x125   :  { %1729 = vmatprep.mubr.f32.mxu0 %v1214_v33  ;;  %1914 = vmatprep.mubr.f32.mxu1 %v1184_v7  ;;  %v1217_v45 = vmul.f32 %v4155_v4, %v395_v32  ;;  %v1187_v19 = vmul.f32 %v3971_v34, %v604_v5 }
 0x126   :  { %v397_v37 = vpop.f32.mrf.mxu0  ;;  %v606_v51 = vpop.f32.mrf.mxu1  ;;  %1730 = vmatmul.mubr.f32.gmra.mxu0 %v1213_v52  ;;  %1915 = vmatmul.mubr.f32.gmra.mxu1 %v1183_v24  ;;  %v4183_v52 = vsel %vm1096_vm2, %v1088_v44, %v3999_v61  ;;  %v1057_v61 = vsel %vm100_vm0, %v4196_v29, %v4043_v0 }
 0x127   :  { %v1218_v57 = vmul.f32 %v4155_v4, %v397_v37  ;;  %v1188_v1 = vmul.f32 %v3971_v34, %v606_v51  ;;  %v4163_v46 = vpop.permute.xlu0 %897  ;;  %v4165_v33 = vpop.permute.xlu1 %993  ;;  %v1090_v0 = vsel %vm1063_vm1, %v1057_v61, %v4045_v23  ;;  %v4855_v23 = vld [vmem:[#allocation11_spill] sm:$0xff] }
 0x128   :  { %v401_v7 = vpop.f32.mrf.mxu0  ;;  %v610_v30 = vpop.f32.mrf.mxu1  ;;  %v1225_v11 = vmul.f32 %v4183_v52, %v4855_v23 }
 0x129   :  { %1734 = vmatprep.mubr.f32.mxu0 %v1218_v57  ;;  %1919 = vmatprep.mubr.f32.mxu1 %v1188_v1  ;;  %v1221_v36 = vmul.f32 %v4179_v60, %v401_v7  ;;  %v1191_v59 = vmul.f32 %v3993_v10, %v610_v30  ;;  %v4854_v57 = vld [vmem:[#allocation12_spill] sm:$0xff]  ;;  %v4219_v30 = vld [vmem:[%s4804_s0 + $0xd8] sm:$0xff] }
 0x12a   :  { %v403_v24 = vpop.f32.mrf.mxu0  ;;  %v612_v37 = vpop.f32.mrf.mxu1  ;;  %1735 = vmatmul.mubr.f32.gmra.mxu0 %v1217_v45  ;;  %1920 = vmatmul.mubr.f32.gmra.mxu1 %v1187_v19  ;;  %v1226_v1 = vmul.f32 %v4183_v52, %v4854_v57  ;;  %v1058_v8 = vsel %vm100_vm0, %v4219_v30, %v4067_v9 }
 0x12b   :  { %v1222_v34 = vmul.f32 %v4179_v60, %v403_v24  ;;  %v1192_v32 = vmul.f32 %v3993_v10, %v612_v37  ;;  %v4189_v5 = vpop.permute.xlu0 %803  ;;  %v4191_v51 = vpop.permute.xlu1 %899  ;;  %v1091_v9 = vsel %vm1063_vm1, %v1058_v8, %v4087_v21  ;;  %v1229_v21 = vmul.f32 %v4207_v28, %v3585_v2 }
 0x12c   :  { %v616_v44 = vpop.f32.mrf.mxu1 }
 0x12d   :  { %1739 = vmatprep.mubr.f32.mxu0 %v1222_v34  ;;  %1924 = vmatprep.mubr.f32.mxu1 %v1192_v32  ;;  %v1195_v24 = vmul.f32 %v4015_v39, %v616_v44  ;;  %v1230_v34 = vmul.f32 %v4207_v28, %v3596_v53  ;;  %v4231_v32 = vsel %vm1096_vm2, %v1090_v0, %v4065_v17  ;;  %v4243_v53 = vld [vmem:[%s4804_s0 + $0xe0] sm:$0xff] }
 0x12e   :  { %v618_v45 = vpop.f32.mrf.mxu1  ;;  %1740 = vmatmul.mubr.f32.gmra.mxu0 %v1221_v36  ;;  %1925 = vmatmul.mubr.f32.gmra.mxu1 %v1191_v59  ;;  %v1059_v17 = vsel %vm100_vm0, %v4243_v53, %v4109_v25 }
 0x12f   :  { %v1196_v19 = vmul.f32 %v4015_v39, %v618_v45  ;;  %v4212_v7 = vpop.permute.xlu0 %995  ;;  %v4214_v10 = vpop.permute.xlu1 %805  ;;  %1744 = vmatprep.mubr.f32.mxu0 %v1226_v1  ;;  %v1234_v1 = vmul.f32 %v4231_v32, %v3623_v47  ;;  %v4255_v45 = vsel %vm1096_vm2, %v1091_v9, %v4089_v54  ;;  %v1092_v25 = vsel %vm1063_vm1, %v1059_v17, %v4111_v31  ;;  %v4267_v47 = vld [vmem:[%s4804_s0 + $0xe8] sm:$0xff]  ;;  %v4856_v31 = vld [vmem:[#allocation13_spill] sm:$0xff] }
 0x130   :  { %v622_v37 = vpop.f32.mrf.mxu1  ;;  %v1060_v54 = vsel %vm100_vm0, %v4267_v47, %v4133_v55  ;;  %v1238_v23 = vmul.f32 %v4255_v45, %v3654_v26  ;;  %v4291_v26 = vld [vmem:[%s4804_s0 + $0xf0] sm:$0xff] }
 0x131   :  { %1929 = vmatprep.mubr.f32.mxu1 %v1196_v19  ;;  %v1199_v44 = vmul.f32 %v4037_v22, %v622_v37  ;;  %v1233_v37 = vmul.f32 %v4231_v32, %v4856_v31  ;;  %v1093_v55 = vsel %vm1063_vm1, %v1060_v54, %v4163_v46  ;;  %v1237_v46 = vmul.f32 %v4255_v45, %v3645_v20 }
 0x132   :  { %v624_v61 = vpop.f32.mrf.mxu1  ;;  %1745 = vmatmul.mubr.f32.gmra.mxu0 %v1225_v11  ;;  %1930 = vmatmul.mubr.f32.gmra.mxu1 %v1195_v24  ;;  %v4279_v11 = vsel %vm1096_vm2, %v1092_v25, %v4131_v41  ;;  %v1061_v41 = vsel %vm100_vm0, %v4291_v26, %v4189_v5 }
 0x133   :  { %v1200_v39 = vmul.f32 %v4037_v22, %v624_v61  ;;  %v4236_v36 = vpop.permute.xlu0 %901  ;;  %v4238_v59 = vpop.permute.xlu1 %997  ;;  %1749 = vmatprep.mubr.f32.mxu0 %v1230_v34  ;;  %v1094_v5 = vsel %vm1063_vm1, %v1061_v41, %v4191_v51  ;;  %v1241_v51 = vmul.f32 %v4279_v11, %v3676_v43 }
 0x134   :  { %v628_v57 = vpop.f32.mrf.mxu1  ;;  %v4327_v54 = vsel %vm1096_vm2, %v1094_v5, %v4212_v7 }
 0x135   :  { %1934 = vmatprep.mubr.f32.mxu1 %v1200_v39  ;;  %v1203_v8 = vmul.f32 %v4059_v18, %v628_v57  ;;  %v4303_v57 = vsel %vm1096_vm2, %v1093_v55, %v4165_v33  ;;  %v1250_v7 = vmul.f32 %v4327_v54, %v3747_v56  ;;  %v4857_v56 = vld [vmem:[#allocation19_spill] sm:$0xff] }
 0x136   :  { %v630_v0 = vpop.f32.mrf.mxu1  ;;  %1750 = vmatmul.mubr.f32.gmra.mxu0 %v1229_v21  ;;  %1935 = vmatmul.mubr.f32.gmra.mxu1 %v1199_v44  ;;  %v1242_v44 = vmul.f32 %v4279_v11, %v3685_v6  ;;  %v4315_v6 = vld [vmem:[%s4804_s0 + $0xf8] sm:$0xff] }
 0x137   :  { %v1204_v22 = vmul.f32 %v4059_v18, %v630_v0  ;;  %1754 = vmatprep.mubr.f32.mxu0 %v1234_v1  ;;  %v4260_v19 = vpop.permute.xlu0 %1257  ;;  %v4262_v2 = vpop.permute.xlu1 %1259  ;;  %v1062_v33 = vsel %vm100_vm0, %v4315_v6, %v4214_v10 }
 0x138   :  { %v634_v24 = vpop.f32.mrf.mxu1  ;;  %v1095_v10 = vsel %vm1063_vm1, %v1062_v33, %v4236_v36 }
 0x139   :  { %1939 = vmatprep.mubr.f32.mxu1 %v1204_v22  ;;  %v1207_v39 = vmul.f32 %v4081_v3, %v634_v24  ;;  %v1246_v22 = vmul.f32 %v4303_v57, %v3719_v40  ;;  %v1245_v40 = vmul.f32 %v4303_v57, %v3710_v48  ;;  %v4343_v36 = vsel %vm1096_vm2, %v1095_v10, %v4238_v59 }
 0x13a   :  { %v636_v34 = vpop.f32.mrf.mxu1  ;;  %1755 = vmatmul.mubr.f32.gmra.mxu0 %v1233_v37  ;;  %1940 = vmatmul.mubr.f32.gmra.mxu1 %v1203_v8  ;;  %v1249_v48 = vmul.f32 %v4327_v54, %v3741_v42  ;;  %v1254_v41 = vmul.f32 %v4343_v36, %v4857_v56 }
 0x13b   :  { %v1208_v18 = vmul.f32 %v4081_v3, %v636_v34  ;;  %1759 = vmatprep.mubr.f32.mxu0 %v1238_v23  ;;  %v4284_v61 = vpop.permute.xlu0 %1261  ;;  %v4286_v9 = vpop.permute.xlu1 %1263 }
 0x13c   :  { %v640_v17 = vpop.f32.mrf.mxu1 }
 0x13d   :  { %1944 = vmatprep.mubr.f32.mxu1 %v1208_v18  ;;  %v1211_v0 = vmul.f32 %v4103_v50, %v640_v17 }
 0x13e   :  { %v642_v21 = vpop.f32.mrf.mxu1  ;;  %1760 = vmatmul.mubr.f32.gmra.mxu0 %v1237_v46  ;;  %1945 = vmatmul.mubr.f32.gmra.mxu1 %v1207_v39 }
 0x13f   :  { %v1212_v3 = vmul.f32 %v4103_v50, %v642_v21  ;;  %1764 = vmatprep.mubr.f32.mxu0 %v1242_v44  ;;  %v4308_v1 = vpop.permute.xlu0 %1265  ;;  %v4310_v20 = vpop.permute.xlu1 %1267  ;;  %v4858_v44 = vld [vmem:[#allocation18_spill] sm:$0xff] }
 0x140   :  { %v646_v25 = vpop.f32.mrf.mxu1  ;;  %v1253_v42 = vmul.f32 %v4343_v36, %v4858_v44  ;;  %v2559_v21 = vld [vmem:[%s4804_s0] sm:$0xff]  ;;  %v4861_v44 = vld [vmem:[#allocation16_spill] sm:$0xff] }
 0x141   :  { %1949 = vmatprep.mubr.f32.mxu1 %v1212_v3  ;;  %v1215_v43 = vmul.f32 %v4125_v58, %v646_v25  ;;  %v1353_v5 = vsel %vm100_vm0, %v2559_v21, %v4260_v19  ;;  %v2560_v25 = vld [vmem:[%s4804_s0 + $0x8] sm:$0xff] }
 0x142   :  { %v648_v8 = vpop.f32.mrf.mxu1  ;;  %1765 = vmatmul.mubr.f32.gmra.mxu0 %v1241_v51  ;;  %1950 = vmatmul.mubr.f32.gmra.mxu1 %v1211_v0  ;;  %v1354_v51 = vsel %vm100_vm0, %v2560_v25, %v4262_v2 }
 0x143   :  { %v1216_v50 = vmul.f32 %v4125_v58, %v648_v8  ;;  %1769 = vmatprep.mubr.f32.mxu0 %v1246_v22  ;;  %v4332_v24 = vpop.permute.xlu0 %1269  ;;  %v2561_v8 = vld [vmem:[%s4804_s0 + $0x10] sm:$0xff] }
 0x144   :  { %v652_v31 = vpop.f32.mrf.mxu1  ;;  %v4337_v37 = vpop.permute.xlu1 %1271  ;;  %v1355_v10 = vsel %vm100_vm0, %v2561_v8, %v4284_v61 }
 0x145   :  { %1954 = vmatprep.mubr.f32.mxu1 %v1216_v50  ;;  %v1219_v58 = vmul.f32 %v4155_v4, %v652_v31 }
 0x146   :  { %v654_v23 = vpop.f32.mrf.mxu1  ;;  %1770 = vmatmul.mubr.f32.gmra.mxu0 %v1245_v40  ;;  %1955 = vmatmul.mubr.f32.gmra.mxu1 %v1215_v43 }
 0x147   :  { %v1220_v34 = vmul.f32 %v4155_v4, %v654_v23  ;;  %1774 = vmatprep.mubr.f32.mxu0 %v1250_v7  ;;  %v2563_v23 = vld [vmem:[%s4804_s0 + $0x20] sm:$0xff] }
 0x148   :  { %v658_v55 = vpop.f32.mrf.mxu1  ;;  %v4349_v18 = vpop.permute.xlu0 %1273 }
 0x149   :  { %1959 = vmatprep.mubr.f32.mxu1 %v1220_v34  ;;  %v4353_v59 = vpop.permute.xlu1 %1275  ;;  %v1223_v4 = vmul.f32 %v4179_v60, %v658_v55  ;;  %v1357_v34 = vsel %vm100_vm0, %v2563_v23, %v4308_v1 }
 0x14a   :  { %v660_v39 = vpop.f32.mrf.mxu1  ;;  %1775 = vmatmul.mubr.f32.gmra.mxu0 %v1249_v48  ;;  %1960 = vmatmul.mubr.f32.gmra.mxu1 %v1219_v58  ;;  %v4859_v48 = vld [vmem:[#allocation14_spill] sm:$0xff] }
 0x14b   :  { %v1224_v17 = vmul.f32 %v4179_v60, %v660_v39  ;;  %1779 = vmatprep.mubr.f32.mxu0 %v1254_v41  ;;  %v4860_v39 = vld [vmem:[#allocation15_spill] sm:$0xff] }
 0x14c   :  { %v664_v46 = vpop.f32.mrf.mxu1  ;;  %v1278_v3 = vpop.permute.xlu0 %1277  ;;  %v1359_v1 = vsel %vm100_vm0, %v4860_v39, %v4332_v24  ;;  %v4862_v24 = vld [vmem:[#allocation17_spill] sm:$0xff] }
 0x14d   :  { %1964 = vmatprep.mubr.f32.mxu1 %v1224_v17  ;;  %v4364_v33 = vpop.permute.xlu1 %1279  ;;  %v1227_v19 = vmul.f32 %v4183_v52, %v664_v46 }
 0x14e   :  { %v666_v0 = vpop.f32.mrf.mxu1  ;;  %1780 = vmatmul.mubr.f32.gmra.mxu0 %v1253_v42  ;;  %1965 = vmatmul.mubr.f32.gmra.mxu1 %v1223_v4 }
 0x14f   :  { %v1228_v60 = vmul.f32 %v4183_v52, %v666_v0  ;;  %2457 = vmatprep.mubr.msk.f32.mxu0 %vm1063_vm1, %v1353_v5  ;;  %v2562_v52 = vld [vmem:[%s4804_s0 + $0x18] sm:$0xff]  ;;  %v1361_v5 = vsel %vm100_vm0, %v4862_v24, %v4349_v18 }
 0x150   :  { %v670_v22 = vpop.f32.mrf.mxu1  ;;  %v1282_v50 = vpop.permute.xlu0 %1281  ;;  %v1356_v40 = vsel %vm100_vm0, %v2562_v52, %v4286_v9 }
 0x151   :  { %1969 = vmatprep.mubr.f32.mxu1 %v1228_v60  ;;  %v1284_v31 = vpop.permute.xlu1 %1283  ;;  %v1231_v61 = vmul.f32 %v4207_v28, %v670_v22  ;;  %v4864_v22 = vld [vmem:[#allocation21_spill] sm:$0xff] }
 0x152   :  { %v672_v43 = vpop.f32.mrf.mxu1  ;;  %1970 = vmatmul.mubr.f32.gmra.mxu1 %v1227_v19  ;;  %2458 = vmatmul.mubr.msk.f32.vlgmr.msra.gmra.mxu0 %vm1063_vm1, %v1354_v51  ;;  %v1363_v18 = vsel %vm100_vm0, %v4864_v22, %v1278_v3 }
 0x153   :  { %v1232_v2 = vmul.f32 %v4207_v28, %v672_v43  ;;  %2460 = vmatprep.mubr.msk.f32.mxu0 %vm1063_vm1, %v1355_v10  ;;  %v1358_v28 = vsel %vm100_vm0, %v4859_v48, %v4310_v20  ;;  %v1360_v20 = vsel %vm100_vm0, %v4861_v44, %v4337_v37  ;;  %v4863_v37 = vld [vmem:[#allocation20_spill] sm:$0xff] }
 0x154   :  { %v676_v7 = vpop.f32.mrf.mxu1  ;;  %v1286_v58 = vpop.permute.xlu0 %1285  ;;  %v1362_v51 = vsel %vm100_vm0, %v4863_v37, %v4353_v59 }
 0x155   :  { %1974 = vmatprep.mubr.f32.mxu1 %v1232_v2  ;;  %v1235_v56 = vmul.f32 %v4231_v32, %v676_v7  ;;  %v1288_v17 = vpop.permute.xlu1 %1287  ;;  %v4865_v2 = vld [vmem:[#allocation22_spill] sm:$0xff] }
 0x156   :  { %v678_v55 = vpop.f32.mrf.mxu1  ;;  %1975 = vmatmul.mubr.f32.gmra.mxu1 %v1231_v61  ;;  %2461 = vmatmul.mubr.msk.f32.gmra.mxu0 %vm1063_vm1, %v1356_v40  ;;  %v1364_v59 = vsel %vm100_vm0, %v4865_v2, %v4364_v33  ;;  %v4866_v40 = vld [vmem:[#allocation23_spill] sm:$0xff] }
 0x157   :  { %v1236_v9 = vmul.f32 %v4231_v32, %v678_v55  ;;  %2463 = vmatprep.mubr.msk.f32.mxu0 %vm1063_vm1, %v1357_v34  ;;  %v1365_v3 = vsel %vm100_vm0, %v4866_v40, %v1282_v50  ;;  %v4867_v34 = vld [vmem:[#allocation3_spill] sm:$0xff]  ;;  %v1367_v50 = vsel %vm100_vm0, %v3932_v15, %v1286_v58 }
 0x158   :  { %v682_v41 = vpop.f32.mrf.mxu1  ;;  %v1290_v32 = vpop.permute.xlu0 %1289  ;;  %v1366_v55 = vsel %vm100_vm0, %v4867_v34, %v1284_v31  ;;  %v1368_v31 = vsel %vm100_vm0, %v3962_v63, %v1288_v17 }
 0x159   :  { %1979 = vmatprep.mubr.f32.mxu1 %v1236_v9  ;;  %v1239_v42 = vmul.f32 %v4255_v45, %v682_v41  ;;  %v1292_v60 = vpop.permute.xlu1 %1291 }
 0x15a   :  { %v684_v4 = vpop.f32.mrf.mxu1  ;;  %1980 = vmatmul.mubr.f32.gmra.mxu1 %v1235_v56  ;;  %2464 = vmatmul.mubr.msk.f32.gmra.mxu0 %vm1063_vm1, %v1358_v28  ;;  %v1370_v58 = vsel %vm100_vm0, %v4006_v35, %v1292_v60 }
 0x15b   :  { %v1240_v46 = vmul.f32 %v4255_v45, %v684_v4  ;;  %2466 = vmatprep.mubr.msk.f32.mxu0 %vm1063_vm1, %v1359_v1 }
 0x15c   :  { %v688_v21 = vpop.f32.mrf.mxu1  ;;  %v1294_v8 = vpop.permute.xlu0 %1293 }
 0x15d   :  { %1984 = vmatprep.mubr.f32.mxu1 %v1240_v46  ;;  %v1243_v45 = vmul.f32 %v4279_v11, %v688_v21  ;;  %v1296_v61 = vpop.permute.xlu1 %1295  ;;  %v1371_v63 = vsel %vm100_vm0, %v4028_v16, %v1294_v8 }
 0x15e   :  { %v690_v0 = vpop.f32.mrf.mxu1  ;;  %1985 = vmatmul.mubr.f32.gmra.mxu1 %v1239_v42  ;;  %2467 = vmatmul.mubr.msk.f32.gmra.mxu0 %vm1063_vm1, %v1360_v20 }
 0x15f   :  { %v1244_v25 = vmul.f32 %v4279_v11, %v690_v0  ;;  %2469 = vmatprep.mubr.msk.f32.mxu0 %vm1063_vm1, %v1361_v5 }
 0x160   :  { %v694_v19 = vpop.f32.mrf.mxu1  ;;  %v1298_v33 = vpop.permute.xlu0 %1297 }
 0x161   :  { %1989 = vmatprep.mubr.f32.mxu1 %v1244_v25  ;;  %v1247_v11 = vmul.f32 %v4303_v57, %v694_v19  ;;  %v1300_v28 = vpop.permute.xlu1 %1299  ;;  %v1373_v1 = vsel %vm100_vm0, %v4072_v13, %v1298_v33 }
 0x162   :  { %v696_v10 = vpop.f32.mrf.mxu1  ;;  %1990 = vmatmul.mubr.f32.gmra.mxu1 %v1243_v45  ;;  %2470 = vmatmul.mubr.msk.f32.gmra.mxu0 %vm1063_vm1, %v1362_v51  ;;  %v1374_v17 = vsel %vm100_vm0, %v4094_v27, %v1300_v28 }
 0x163   :  { %v1248_v43 = vmul.f32 %v4303_v57, %v696_v10  ;;  %2472 = vmatprep.mubr.msk.f32.mxu0 %vm1063_vm1, %v1363_v18 }
 0x164   :  { %v700_v52 = vpop.f32.mrf.mxu1 }
 0x165   :  { %1994 = vmatprep.mubr.f32.mxu1 %v1248_v43  ;;  %v1251_v57 = vmul.f32 %v4327_v54, %v700_v52  ;;  %v1302_v15 = vpop.permute.xlu0 %1301  ;;  %v1304_v39 = vpop.permute.xlu1 %1303 }
 0x166   :  { %v702_v7 = vpop.f32.mrf.mxu1  ;;  %1995 = vmatmul.mubr.f32.gmra.mxu1 %v1247_v11  ;;  %2473 = vmatmul.mubr.msk.f32.gmra.mxu0 %vm1063_vm1, %v1364_v59  ;;  %v1375_v16 = vsel %vm100_vm0, %v4116_v62, %v1302_v15 }
 0x167   :  { %v1252_v23 = vmul.f32 %v4327_v54, %v702_v7  ;;  %2475 = vmatprep.mubr.msk.f32.mxu0 %vm1063_vm1, %v1365_v3  ;;  %v1369_v54 = vsel %vm100_vm0, %v3984_v12, %v1290_v32 }
 0x168   :  { %v706_v9 = vpop.f32.mrf.mxu1 }
 0x169   :  { %1999 = vmatprep.mubr.f32.mxu1 %v1252_v23  ;;  %v1255_v41 = vmul.f32 %v4343_v36, %v706_v9  ;;  %v1306_v12 = vpop.permute.xlu0 %1305  ;;  %v1308_v35 = vpop.permute.xlu1 %1307 }
 0x16a   :  { %v708_v48 = vpop.f32.mrf.mxu1  ;;  %2000 = vmatmul.mubr.f32.gmra.mxu1 %v1251_v57  ;;  %2476 = vmatmul.mubr.msk.f32.gmra.mxu0 %vm1063_vm1, %v1366_v55  ;;  %v1377_v13 = vsel %vm100_vm0, %v4146_v14, %v1306_v12  ;;  %v1378_v27 = vsel %vm100_vm0, %v4170_v38, %v1308_v35 }
 0x16b   :  { %v1256_v56 = vmul.f32 %v4343_v36, %v708_v48  ;;  %2478 = vmatprep.mubr.msk.f32.mxu0 %vm1063_vm1, %v1367_v50  ;;  %v1372_v36 = vsel %vm100_vm0, %v4050_v49, %v1296_v61  ;;  %v4868_v49 = vld [vmem:[#allocation2_spill] sm:$0xff] }
 0x16c   :  { %v1376_v46 = vsel %vm100_vm0, %v4868_v49, %v1304_v39 }
 0x16d   :  { %2004 = vmatprep.mubr.f32.mxu1 %v1256_v56  ;;  %v1310_v4 = vpop.permute.xlu0 %1309  ;;  %v1312_v44 = vpop.permute.xlu1 %1311 }
 0x16e   :  { %2005 = vmatmul.mubr.f32.gmra.mxu1 %v1255_v41  ;;  %2479 = vmatmul.mubr.msk.f32.gmra.mxu0 %vm1063_vm1, %v1368_v31  ;;  %v1379_v20 = vsel %vm100_vm0, %v4196_v29, %v1310_v4  ;;  %v1380_v42 = vsel %vm100_vm0, %v4219_v30, %v1312_v44 }
 0x16f   :  { %2481 = vmatprep.mubr.msk.f32.mxu0 %vm1063_vm1, %v1369_v54 }
 0x171   :  { %v1314_v62 = vpop.permute.xlu0 %1313  ;;  %v1316_v32 = vpop.permute.xlu1 %1315 }
 0x172   :  { %2482 = vmatmul.mubr.msk.f32.gmra.mxu0 %vm1063_vm1, %v1370_v58  ;;  %v1381_v14 = vsel %vm100_vm0, %v4243_v53, %v1314_v62  ;;  %v1382_v38 = vsel %vm100_vm0, %v4267_v47, %v1316_v32 }
 0x173   :  { %2484 = vmatprep.mubr.msk.f32.mxu0 %vm1063_vm1, %v1371_v63 }
 0x175   :  { %v1318_v21 = vpop.permute.xlu0 %1317  ;;  %v1320_v24 = vpop.permute.xlu1 %1319 }
 0x176   :  { %2485 = vmatmul.mubr.msk.f32.gmra.mxu0 %vm1063_vm1, %v1372_v36  ;;  %v1383_v29 = vsel %vm100_vm0, %v4291_v26, %v1318_v21  ;;  %v1384_v30 = vsel %vm100_vm0, %v4315_v6, %v1320_v24  ;;  %v4497_v6 = vld [vmem:[%s4807_s4] ss:$0 sm:$0xff] }
 0x177   :  { %2487 = vmatprep.mubr.msk.f32.mxu0 %vm1063_vm1, %v1373_v1 }
 0x17a   :  { %2488 = vmatmul.mubr.msk.f32.gmra.mxu0 %vm1063_vm1, %v1374_v17 }
 0x17b   :  { %2490 = vmatprep.mubr.msk.f32.mxu0 %vm1063_vm1, %v1375_v16 }
 0x17e   :  { %2491 = vmatmul.mubr.msk.f32.gmra.mxu0 %vm1063_vm1, %v1376_v46 }
 0x17f   :  { %2493 = vmatprep.mubr.msk.f32.mxu0 %vm1063_vm1, %v1377_v13 }
 0x182   :  { %2494 = vmatmul.mubr.msk.f32.gmra.mxu0 %vm1063_vm1, %v1378_v27 }
 0x183   :  { %2496 = vmatprep.mubr.msk.f32.mxu0 %vm1063_vm1, %v1379_v20 }
 0x186   :  { %2497 = vmatmul.mubr.msk.f32.gmra.mxu0 %vm1063_vm1, %v1380_v42 }
 0x187   :  { %2499 = vmatprep.mubr.msk.f32.mxu0 %vm1063_vm1, %v1381_v14 }
 0x18a   :  { %2500 = vmatmul.mubr.msk.f32.gmra.mxu0 %vm1063_vm1, %v1382_v38 }
 0x18b   :  { %2502 = vmatprep.mubr.msk.f32.mxu0 %vm1063_vm1, %v1383_v29 }
 0x18e   :  { %2503 = vmatmul.mubr.msk.f32.gmra.mxu0 %vm1063_vm1, %v1384_v30 }
 0x192   :  { %v1626_v53 = vpop.f32.mrf.mxu0 }
 0x193   :  { %v1627_v2 = vadd.f32 %v4497_v6, %v1626_v53 }
 0x194   :  { %v1628_v5 = vpop.f32.mrf.mxu0 }
 0x196   :  { %v1631_v0 = vpop.f32.mrf.mxu0 }
 0x197   :  { %v1632_v61 = vadd.f32 %v4497_v6, %v1631_v0 }
 0x198   :  { %v1633_v60 = vpop.f32.mrf.mxu0 }
 0x19a   :  { %v1636_v47 = vpop.f32.mrf.mxu0 }
 0x19b   :  { %v1637_v57 = vadd.f32 %v4497_v6, %v1636_v47 }
 0x19c   :  { %v1638_v25 = vpop.f32.mrf.mxu0 }
 0x19e   :  { %v1641_v37 = vpop.f32.mrf.mxu0 }
 0x19f   :  { %v1642_v31 = vadd.f32 %v4497_v6, %v1641_v37 }
 0x1a0   :  { %v1643_v51 = vpop.f32.mrf.mxu0 }
 0x1a2   :  { %v1646_v45 = vpop.f32.mrf.mxu0 }
 0x1a3   :  { %v1647_v39 = vadd.f32 %v4497_v6, %v1646_v45 }
 0x1a4   :  { %v1648_v26 = vpop.f32.mrf.mxu0 }
 0x1a6   :  { %v1651_v19 = vpop.f32.mrf.mxu0 }
 0x1a7   :  { %v1652_v16 = vadd.f32 %v4497_v6, %v1651_v19 }
 0x1a8   :  { %v1653_v22 = vpop.f32.mrf.mxu0 }
 0x1aa   :  { %v1656_v18 = vpop.f32.mrf.mxu0 }
 0x1ab   :  { %v1657_v27 = vadd.f32 %v4497_v6, %v1656_v18 }
 0x1ac   :  { %v1658_v8 = vpop.f32.mrf.mxu0 }
 0x1ae   :  { %v1661_v10 = vpop.f32.mrf.mxu0 }
 0x1af   :  { %v1662_v21 = vadd.f32 %v4497_v6, %v1661_v10 }
 0x1b0   :  { %v1663_v43 = vpop.f32.mrf.mxu0 }
 0x1b2   :  { %v1666_v59 = vpop.f32.mrf.mxu0  ;;  %v1851_v11 = vpop.f32.mrf.mxu1 }
 0x1b3   :  { %v4500_v52 = vadd.f32 %v1851_v11, %v1627_v2  ;;  %v1667_v5 = vadd.f32 %v4497_v6, %v1666_v59 }
 0x1b4   :  { %v1668_v40 = vpop.f32.mrf.mxu0  ;;  %v1853_v3 = vpop.f32.mrf.mxu1 }
 0x1b6   :  { %v1671_v7 = vpop.f32.mrf.mxu0  ;;  %v1856_v23 = vpop.f32.mrf.mxu1 }
 0x1b7   :  { %v4503_v34 = vadd.f32 %v1856_v23, %v1632_v61  ;;  %v1672_v51 = vadd.f32 %v4497_v6, %v1671_v7 }
 0x1b8   :  { %v1673_v55 = vpop.f32.mrf.mxu0  ;;  %v1858_v33 = vpop.f32.mrf.mxu1 }
 0x1ba   :  { %v1676_v9 = vpop.f32.mrf.mxu0  ;;  %v1861_v50 = vpop.f32.mrf.mxu1 }
 0x1bb   :  { %v4506_v48 = vadd.f32 %v1861_v50, %v1637_v57  ;;  %v1677_v8 = vadd.f32 %v4497_v6, %v1676_v9 }
 0x1bc   :  { %v1678_v28 = vpop.f32.mrf.mxu0  ;;  %v1863_v56 = vpop.f32.mrf.mxu1 }
 0x1be   :  { %v1681_v41 = vpop.f32.mrf.mxu0  ;;  %v1866_v54 = vpop.f32.mrf.mxu1 }
 0x1bf   :  { %v4509_v15 = vadd.f32 %v1866_v54, %v1642_v31  ;;  %v1682_v40 = vadd.f32 %v4497_v6, %v1681_v41 }
 0x1c0   :  { %v1683_v58 = vpop.f32.mrf.mxu0  ;;  %v1868_v63 = vpop.f32.mrf.mxu1 }
 0x1c2   :  { %v1686_v36 = vpop.f32.mrf.mxu0  ;;  %v1871_v12 = vpop.f32.mrf.mxu1 }
 0x1c3   :  { %v4512_v1 = vadd.f32 %v1871_v12, %v1647_v39  ;;  %v1687_v33 = vadd.f32 %v4497_v6, %v1686_v36 }
 0x1c4   :  { %v1688_v35 = vpop.f32.mrf.mxu0  ;;  %v1873_v17 = vpop.f32.mrf.mxu1 }
 0x1c6   :  { %v1691_v4 = vpop.f32.mrf.mxu0  ;;  %v1876_v49 = vpop.f32.mrf.mxu1 }
 0x1c7   :  { %v4515_v46 = vadd.f32 %v1876_v49, %v1652_v16  ;;  %v1692_v31 = vadd.f32 %v4497_v6, %v1691_v4 }
 0x1c8   :  { %v1693_v13 = vpop.f32.mrf.mxu0  ;;  %v1878_v44 = vpop.f32.mrf.mxu1 }
 0x1ca   :  { %v1696_v62 = vpop.f32.mrf.mxu0  ;;  %v1881_v20 = vpop.f32.mrf.mxu1 }
 0x1cb   :  { %v4518_v32 = vadd.f32 %v1881_v20, %v1657_v27  ;;  %v1697_v12 = vadd.f32 %v4497_v6, %v1696_v62 }
 0x1cc   :  { %v1698_v42 = vpop.f32.mrf.mxu0  ;;  %v1883_v14 = vpop.f32.mrf.mxu1 }
 0x1ce   :  { %v4521_v38 = vpop.f32.mrf.mxu0  ;;  %v1886_v29 = vpop.f32.mrf.mxu1 }
 0x1cf   :  { %v4523_v24 = vadd.f32 %v1886_v29, %v1662_v21 }
 0x1d0   :  { %v1703_v30 = vpop.f32.mrf.mxu0  ;;  %v1888_v53 = vpop.f32.mrf.mxu1 }
 0x1d2   :  { %v1706_v0 = vpop.f32.mrf.mxu0  ;;  %v1891_v60 = vpop.f32.mrf.mxu1 }
 0x1d3   :  { %v4526_v47 = vadd.f32 %v1891_v60, %v1667_v5  ;;  %v1707_v20 = vadd.f32 %v4497_v6, %v1706_v0 }
 0x1d4   :  { %v1708_v25 = vpop.f32.mrf.mxu0  ;;  %v1893_v37 = vpop.f32.mrf.mxu1 }
 0x1d6   :  { %v4529_v45 = vpop.f32.mrf.mxu0  ;;  %v1896_v26 = vpop.f32.mrf.mxu1 }
 0x1d7   :  { %v4531_v19 = vadd.f32 %v1896_v26, %v1672_v51 }
 0x1d8   :  { %v1713_v22 = vpop.f32.mrf.mxu0  ;;  %v1898_v18 = vpop.f32.mrf.mxu1 }
 0x1da   :  { %v4534_v10 = vpop.f32.mrf.mxu0  ;;  %v1901_v43 = vpop.f32.mrf.mxu1 }
 0x1db   :  { %v4536_v2 = vadd.f32 %v1901_v43, %v1677_v8 }
 0x1dc   :  { %v1718_v59 = vpop.f32.mrf.mxu0  ;;  %v1903_v11 = vpop.f32.mrf.mxu1 }
 0x1de   :  { %v4539_v3 = vpop.f32.mrf.mxu0  ;;  %v1906_v61 = vpop.f32.mrf.mxu1 }
 0x1df   :  { %v4541_v7 = vadd.f32 %v1906_v61, %v1682_v40 }
 0x1e0   :  { %v1723_v23 = vpop.f32.mrf.mxu0  ;;  %v1908_v55 = vpop.f32.mrf.mxu1 }
 0x1e2   :  { %v4544_v57 = vpop.f32.mrf.mxu0  ;;  %v1911_v9 = vpop.f32.mrf.mxu1 }
 0x1e3   :  { %v4546_v50 = vadd.f32 %v1911_v9, %v1687_v33 }
 0x1e4   :  { %v1728_v28 = vpop.f32.mrf.mxu0  ;;  %v1913_v56 = vpop.f32.mrf.mxu1 }
 0x1e6   :  { %v4549_v54 = vpop.f32.mrf.mxu0  ;;  %v1916_v41 = vpop.f32.mrf.mxu1 }
 0x1e7   :  { %v4551_v58 = vadd.f32 %v1916_v41, %v1692_v31 }
 0x1e8   :  { %v1733_v63 = vpop.f32.mrf.mxu0  ;;  %v1918_v39 = vpop.f32.mrf.mxu1 }
 0x1ea   :  { %v4554_v35 = vpop.f32.mrf.mxu0  ;;  %v1921_v36 = vpop.f32.mrf.mxu1 }
 0x1eb   :  { %v4556_v17 = vadd.f32 %v1921_v36, %v1697_v12 }
 0x1ec   :  { %v1738_v16 = vpop.f32.mrf.mxu0  ;;  %v1923_v49 = vpop.f32.mrf.mxu1 }
 0x1ee   :  { %v4558_v13 = vpop.f32.mrf.mxu0  ;;  %v4560_v44 = vpop.f32.mrf.mxu1 }
 0x1f0   :  { %v1743_v4 = vpop.f32.mrf.mxu0  ;;  %v1928_v27 = vpop.f32.mrf.mxu1 }
 0x1f2   :  { %v4563_v42 = vpop.f32.mrf.mxu0  ;;  %v1931_v14 = vpop.f32.mrf.mxu1 }
 0x1f3   :  { %v4565_v21 = vadd.f32 %v1931_v14, %v1707_v20 }
 0x1f4   :  { %v1748_v62 = vpop.f32.mrf.mxu0  ;;  %v1933_v29 = vpop.f32.mrf.mxu1 }
 0x1f6   :  { %v4567_v30 = vpop.f32.mrf.mxu0  ;;  %v4569_v53 = vpop.f32.mrf.mxu1 }
 0x1f8   :  { %v1753_v5 = vpop.f32.mrf.mxu0  ;;  %v1938_v60 = vpop.f32.mrf.mxu1 }
 0x1fa   :  { %v4571_v25 = vpop.f32.mrf.mxu0  ;;  %v4573_v37 = vpop.f32.mrf.mxu1 }
 0x1fc   :  { %v1758_v51 = vpop.f32.mrf.mxu0  ;;  %v1943_v26 = vpop.f32.mrf.mxu1 }
 0x1fe   :  { %v4575_v0 = vpop.f32.mrf.mxu0  ;;  %v4577_v22 = vpop.f32.mrf.mxu1 }
 0x200   :  { %v1763_v18 = vpop.f32.mrf.mxu0  ;;  %v1948_v8 = vpop.f32.mrf.mxu1 }
 0x202   :  { %v4579_v43 = vpop.f32.mrf.mxu0  ;;  %v4581_v59 = vpop.f32.mrf.mxu1 }
 0x204   :  { %v1768_v11 = vpop.f32.mrf.mxu0  ;;  %v1953_v40 = vpop.f32.mrf.mxu1 }
 0x206   :  { %v4583_v61 = vpop.f32.mrf.mxu0  ;;  %v4585_v23 = vpop.f32.mrf.mxu1 }
 0x208   :  { %v1773_v55 = vpop.f32.mrf.mxu0  ;;  %v1958_v33 = vpop.f32.mrf.mxu1 }
 0x20a   :  { %v4587_v9 = vpop.f32.mrf.mxu0  ;;  %v4589_v28 = vpop.f32.mrf.mxu1 }
 0x20c   :  { %v1778_v56 = vpop.f32.mrf.mxu0  ;;  %v1963_v31 = vpop.f32.mrf.mxu1 }
 0x20e   :  { %v4591_v41 = vpop.f32.mrf.mxu0  ;;  %v4593_v63 = vpop.f32.mrf.mxu1 }
 0x210   :  { %v1783_v39 = vpop.f32.mrf.mxu0  ;;  %v1968_v12 = vpop.f32.mrf.mxu1 }
 0x212   :  { %v4595_v36 = vpop.f32.mrf.mxu1  ;;  %v2459_v16 = vpop.f32.mrf.mxu0 }
 0x213   :  { %v2082_v49 = vadd.f32 %v2459_v16, %v4503_v34 }
 0x214   :  { %v1973_v4 = vpop.f32.mrf.mxu1  ;;  %v2076_v27 = vpop.f32.mrf.mxu0 }
 0x215   :  { %v2236_v20 = vmax.f32 %v2082_v49, 0.0  ;;  %v2077_v14 = vadd.f32 %v2076_v27, %v4500_v52 }
 0x216   :  { %v4599_v62 = vpop.f32.mrf.mxu1  ;;  %v2462_v29 = vpop.f32.mrf.mxu0 }
 0x217   :  { %2269 = vst.msk [vmem:[%s4808_s5 + $0x8] sm:$0xff] %vm2267_vm3, %v2236_v20  ;;  %v2235_v5 = vmax.f32 %v2077_v14, 0.0  ;;  %v2092_v60 = vadd.f32 %v2462_v29, %v4509_v15 }
 0x218   :  { %v1978_v51 = vpop.f32.mrf.mxu1  ;;  %v2086_v26 = vpop.f32.mrf.mxu0 }
 0x219   :  { %2268 = vst.msk [vmem:[%s4808_s5] sm:$0xff] %vm2267_vm3, %v2235_v5  ;;  %v2238_v34 = vmax.f32 %v2092_v60, 0.0  ;;  %v2087_v52 = vadd.f32 %v2086_v26, %v4506_v48 }
 0x21a   :  { %v4611_v18 = vpop.f32.mrf.mxu1  ;;  %v2465_v8 = vpop.f32.mrf.mxu0 }
 0x21b   :  { %2271 = vst.msk [vmem:[%s4808_s5 + $0x18] sm:$0xff] %vm2267_vm3, %v2238_v34  ;;  %v2237_v11 = vmax.f32 %v2087_v52, 0.0  ;;  %v2102_v15 = vadd.f32 %v2465_v8, %v4515_v46 }
 0x21c   :  { %v1983_v40 = vpop.f32.mrf.mxu1  ;;  %v2096_v55 = vpop.f32.mrf.mxu0 }
 0x21d   :  { %2270 = vst.msk [vmem:[%s4808_s5 + $0x10] sm:$0xff] %vm2267_vm3, %v2237_v11  ;;  %v2240_v33 = vmax.f32 %v2102_v15, 0.0  ;;  %v2097_v48 = vadd.f32 %v2096_v55, %v4512_v1  ;;  %v1702_v40 = vadd.f32 %v4497_v6, %v4521_v38 }
 0x21e   :  { %v4623_v56 = vpop.f32.mrf.mxu1  ;;  %v2468_v31 = vpop.f32.mrf.mxu0 }
 0x21f   :  { %2273 = vst.msk [vmem:[%s4808_s5 + $0x28] sm:$0xff] %vm2267_vm3, %v2240_v33  ;;  %v2239_v39 = vmax.f32 %v2097_v48, 0.0  ;;  %v2112_v46 = vadd.f32 %v2468_v31, %v4523_v24  ;;  %v1927_v31 = vadd.f32 %v4560_v44, %v1702_v40  ;;  %v1737_v40 = vadd.f32 %v4497_v6, %v4554_v35 }
 0x220   :  { %v1988_v12 = vpop.f32.mrf.mxu1  ;;  %v2106_v16 = vpop.f32.mrf.mxu0 }
 0x221   :  { %2272 = vst.msk [vmem:[%s4808_s5 + $0x20] sm:$0xff] %vm2267_vm3, %v2239_v39  ;;  %v2242_v49 = vmax.f32 %v2112_v46, 0.0  ;;  %v2107_v1 = vadd.f32 %v2106_v16, %v4518_v32  ;;  %v1712_v12 = vadd.f32 %v4497_v6, %v4529_v45 }
 0x222   :  { %v4635_v4 = vpop.f32.mrf.mxu1  ;;  %v2471_v27 = vpop.f32.mrf.mxu0 }
 0x223   :  { %2275 = vst.msk [vmem:[%s4808_s5 + $0x38] sm:$0xff] %vm2267_vm3, %v2242_v49  ;;  %v2241_v20 = vmax.f32 %v2107_v1, 0.0  ;;  %v2122_v24 = vadd.f32 %v2471_v27, %v4531_v19  ;;  %v1937_v1 = vadd.f32 %v4569_v53, %v1712_v12  ;;  %v1762_v12 = vadd.f32 %v4497_v6, %v4575_v0 }
 0x224   :  { %v1993_v14 = vpop.f32.mrf.mxu1  ;;  %v2116_v29 = vpop.f32.mrf.mxu0 }
 0x225   :  { %2274 = vst.msk [vmem:[%s4808_s5 + $0x30] sm:$0xff] %vm2267_vm3, %v2241_v20  ;;  %v2244_v5 = vmax.f32 %v2122_v24, 0.0  ;;  %v2117_v32 = vadd.f32 %v2116_v29, %v4526_v47  ;;  %v1722_v20 = vadd.f32 %v4497_v6, %v4539_v3  ;;  %v1717_v29 = vadd.f32 %v4497_v6, %v4534_v10 }
 0x226   :  { %v4647_v60 = vpop.f32.mrf.mxu1  ;;  %v2474_v51 = vpop.f32.mrf.mxu0 }
 0x227   :  { %2277 = vst.msk [vmem:[%s4808_s5 + $0x48] sm:$0xff] %vm2267_vm3, %v2244_v5  ;;  %v2243_v26 = vmax.f32 %v2117_v32, 0.0  ;;  %v2132_v19 = vadd.f32 %v2474_v51, %v4541_v7  ;;  %v1947_v5 = vadd.f32 %v4577_v22, %v1722_v20  ;;  %v1732_v51 = vadd.f32 %v4497_v6, %v4549_v54 }
 0x228   :  { %v1998_v34 = vpop.f32.mrf.mxu1  ;;  %v2126_v52 = vpop.f32.mrf.mxu0  ;;  %v1767_v20 = vadd.f32 %v4497_v6, %v4579_v43 }
 0x229   :  { %2276 = vst.msk [vmem:[%s4808_s5 + $0x40] sm:$0xff] %vm2267_vm3, %v2243_v26  ;;  %v2246_v8 = vmax.f32 %v2132_v19, 0.0  ;;  %v2127_v47 = vadd.f32 %v2126_v52, %v4536_v2  ;;  %v1942_v26 = vadd.f32 %v4573_v37, %v1717_v29  ;;  %v1727_v34 = vadd.f32 %v4497_v6, %v4544_v57 }
 0x22a   :  { %v4659_v11 = vpop.f32.mrf.mxu1  ;;  %v2477_v15 = vpop.f32.mrf.mxu0  ;;  %v1957_v52 = vadd.f32 %v4585_v23, %v1732_v51  ;;  %v1992_v29 = vadd.f32 %v4635_v4, %v1767_v20 }
 0x22b   :  { %2279 = vst.msk [vmem:[%s4808_s5 + $0x58] sm:$0xff] %vm2267_vm3, %v2246_v8  ;;  %v2245_v7 = vmax.f32 %v2127_v47, 0.0  ;;  %v2142_v55 = vadd.f32 %v2477_v15, %v4551_v58  ;;  %v1742_v8 = vadd.f32 %v4497_v6, %v4558_v13  ;;  %v1952_v47 = vadd.f32 %v4581_v59, %v1727_v34 }
 0x22c   :  { %v2003_v33 = vpop.f32.mrf.mxu1  ;;  %v2136_v48 = vpop.f32.mrf.mxu0 }
 0x22d   :  { %2278 = vst.msk [vmem:[%s4808_s5 + $0x50] sm:$0xff] %vm2267_vm3, %v2245_v7  ;;  %v2248_v2 = vmax.f32 %v2142_v55, 0.0  ;;  %v2137_v38 = vadd.f32 %v2136_v48, %v4546_v50  ;;  %v1967_v7 = vadd.f32 %v4593_v63, %v1742_v8  ;;  %v1752_v33 = vadd.f32 %v4497_v6, %v4567_v30 }
 0x22e   :  { %v4674_v39 = vpop.f32.mrf.mxu1  ;;  %v2480_v46 = vpop.f32.mrf.mxu0  ;;  %v1962_v48 = vadd.f32 %v4589_v28, %v1737_v40 }
 0x22f   :  { %2281 = vst.msk [vmem:[%s4808_s5 + $0x68] sm:$0xff] %vm2267_vm3, %v2248_v2  ;;  %v2247_v58 = vmax.f32 %v2137_v38, 0.0  ;;  %v2152_v44 = vadd.f32 %v2480_v46, %v1927_v31  ;;  %v1747_v2 = vadd.f32 %v4497_v6, %v4563_v42  ;;  %v1977_v38 = vadd.f32 %v4599_v62, %v1752_v33 }
 0x230   :  { %v2008_v16 = vpop.f32.mrf.mxu1  ;;  %v2146_v49 = vpop.f32.mrf.mxu0 }
 0x231   :  { %2280 = vst.msk [vmem:[%s4808_s5 + $0x60] sm:$0xff] %vm2267_vm3, %v2247_v58  ;;  %v2250_v50 = vmax.f32 %v2152_v44, 0.0  ;;  %v2147_v27 = vadd.f32 %v2146_v49, %v4556_v17  ;;  %v1972_v58 = vadd.f32 %v4595_v36, %v1747_v2  ;;  %v1757_v16 = vadd.f32 %v4497_v6, %v4571_v25 }
 0x232   :  { %v2483_v45 = vpop.f32.mrf.mxu0  ;;  %v1987_v49 = vadd.f32 %v4623_v56, %v1762_v12 }
 0x233   :  { %2283 = vst.msk [vmem:[%s4808_s5 + $0x78] sm:$0xff] %vm2267_vm3, %v2250_v50  ;;  %v2249_v24 = vmax.f32 %v2147_v27, 0.0  ;;  %v2162_v14 = vadd.f32 %v2483_v45, %v1937_v1  ;;  %v1772_v50 = vadd.f32 %v4497_v6, %v4583_v61  ;;  %v1982_v27 = vadd.f32 %v4611_v18, %v1757_v16 }
 0x234   :  { %v2156_v53 = vpop.f32.mrf.mxu0 }
 0x235   :  { %2282 = vst.msk [vmem:[%s4808_s5 + $0x70] sm:$0xff] %vm2267_vm3, %v2249_v24  ;;  %v2252_v17 = vmax.f32 %v2162_v14, 0.0  ;;  %v2157_v3 = vadd.f32 %v2156_v53, %v4565_v21  ;;  %v1997_v24 = vadd.f32 %v4647_v60, %v1772_v50  ;;  %v1782_v53 = vadd.f32 %v4497_v6, %v4591_v41 }
 0x236   :  { %v2486_v32 = vpop.f32.mrf.mxu0 }
 0x237   :  { %2285 = vst.msk [vmem:[%s4808_s5 + $0x88] sm:$0xff] %vm2267_vm3, %v2252_v17  ;;  %v2251_v10 = vmax.f32 %v2157_v3, 0.0  ;;  %v2172_v22 = vadd.f32 %v2486_v32, %v1947_v5  ;;  %v1777_v17 = vadd.f32 %v4497_v6, %v4587_v9  ;;  %v2007_v3 = vadd.f32 %v4674_v39, %v1782_v53 }
 0x238   :  { %v2166_v19 = vpop.f32.mrf.mxu0 }
 0x239   :  { %2284 = vst.msk [vmem:[%s4808_s5 + $0x80] sm:$0xff] %vm2267_vm3, %v2251_v10  ;;  %v2254_v54 = vmax.f32 %v2172_v22, 0.0  ;;  %v2167_v21 = vadd.f32 %v2166_v19, %v1942_v26  ;;  %v2002_v51 = vadd.f32 %v4659_v11, %v1777_v17 }
 0x23a   :  { %v2489_v37 = vpop.f32.mrf.mxu0 }
 0x23b   :  { %2287 = vst.msk [vmem:[%s4808_s5 + $0x98] sm:$0xff] %vm2267_vm3, %v2254_v54  ;;  %v2253_v57 = vmax.f32 %v2167_v21, 0.0  ;;  %v2182_v23 = vadd.f32 %v2489_v37, %v1957_v52 }
 0x23c   :  { %v2176_v15 = vpop.f32.mrf.mxu0 }
 0x23d   :  { %2286 = vst.msk [vmem:[%s4808_s5 + $0x90] sm:$0xff] %vm2267_vm3, %v2253_v57  ;;  %v2256_v13 = vmax.f32 %v2182_v23, 0.0  ;;  %v2177_v59 = vadd.f32 %v2176_v15, %v1952_v47 }
 0x23e   :  { %v2492_v55 = vpop.f32.mrf.mxu0 }
 0x23f   :  { %2289 = vst.msk [vmem:[%s4808_s5 + $0xa8] sm:$0xff] %vm2267_vm3, %v2256_v13  ;;  %v2255_v35 = vmax.f32 %v2177_v59, 0.0  ;;  %v2192_v63 = vadd.f32 %v2492_v55, %v1967_v7 }
 0x240   :  { %v2186_v31 = vpop.f32.mrf.mxu0 }
 0x241   :  { %2288 = vst.msk [vmem:[%s4808_s5 + $0xa0] sm:$0xff] %vm2267_vm3, %v2255_v35  ;;  %v2258_v30 = vmax.f32 %v2192_v63, 0.0  ;;  %v2187_v28 = vadd.f32 %v2186_v31, %v1962_v48 }
 0x242   :  { %v2495_v46 = vpop.f32.mrf.mxu0 }
 0x243   :  { %2291 = vst.msk [vmem:[%s4808_s5 + $0xb8] sm:$0xff] %vm2267_vm3, %v2258_v30  ;;  %v2257_v42 = vmax.f32 %v2187_v28, 0.0  ;;  %v2202_v62 = vadd.f32 %v2495_v46, %v1977_v38 }
 0x244   :  { %v2196_v44 = vpop.f32.mrf.mxu0 }
 0x245   :  { %2290 = vst.msk [vmem:[%s4808_s5 + $0xb0] sm:$0xff] %vm2267_vm3, %v2257_v42  ;;  %v2260_v0 = vmax.f32 %v2202_v62, 0.0  ;;  %v2197_v36 = vadd.f32 %v2196_v44, %v1972_v58 }
 0x246   :  { %v2498_v1 = vpop.f32.mrf.mxu0 }
 0x247   :  { %2293 = vst.msk [vmem:[%s4808_s5 + $0xc8] sm:$0xff] %vm2267_vm3, %v2260_v0  ;;  %v2259_v25 = vmax.f32 %v2197_v36, 0.0  ;;  %v2212_v56 = vadd.f32 %v2498_v1, %v1987_v49 }
 0x248   :  { %v2206_v45 = vpop.f32.mrf.mxu0 }
 0x249   :  { %2292 = vst.msk [vmem:[%s4808_s5 + $0xc0] sm:$0xff] %vm2267_vm3, %v2259_v25  ;;  %v2262_v61 = vmax.f32 %v2212_v56, 0.0  ;;  %v2207_v18 = vadd.f32 %v2206_v45, %v1982_v27 }
 0x24a   :  { %v2501_v14 = vpop.f32.mrf.mxu0 }
 0x24b   :  { %2295 = vst.msk [vmem:[%s4808_s5 + $0xd8] sm:$0xff] %vm2267_vm3, %v2262_v61  ;;  %v2261_v43 = vmax.f32 %v2207_v18, 0.0  ;;  %v2222_v60 = vadd.f32 %v2501_v14, %v1997_v24 }
 0x24c   :  { %v2216_v5 = vpop.f32.mrf.mxu0 }
 0x24d   :  { %2294 = vst.msk [vmem:[%s4808_s5 + $0xd0] sm:$0xff] %vm2267_vm3, %v2261_v43  ;;  %v2264_v41 = vmax.f32 %v2222_v60, 0.0  ;;  %v2217_v4 = vadd.f32 %v2216_v5, %v1992_v29 }
 0x24e   :  { %v2504_v32 = vpop.f32.mrf.mxu0 }
 0x24f   :  { %2297 = vst.msk [vmem:[%s4808_s5 + $0xe8] sm:$0xff] %vm2267_vm3, %v2264_v41  ;;  %v2263_v26 = vmax.f32 %v2217_v4, 0.0  ;;  %v2232_v10 = vadd.f32 %v2504_v32, %v2007_v3 }
 0x250   :  { %v2226_v6 = vpop.f32.mrf.mxu0 }
 0x251   :  { %2296 = vst.msk [vmem:[%s4808_s5 + $0xe0] sm:$0xff] %vm2267_vm3, %v2263_v26  ;;  %v2266_v9 = vmax.f32 %v2232_v10, 0.0  ;;  %v2227_v39 = vadd.f32 %v2226_v6, %v2002_v51 }
 0x253   :  { %2299 = vst.msk [vmem:[%s4808_s5 + $0xf8] sm:$0xff] %vm2267_vm3, %v2266_v9  ;;  %v2265_v11 = vmax.f32 %v2227_v39, 0.0 }
 0x255   :  { %2298 = vst.msk [vmem:[%s4808_s5 + $0xf0] sm:$0xff] %vm2267_vm3, %v2265_v11 }

</bundles_post_ra>
